<compile_context>
chip_gen: v7x
topology: tpu7x:2x2x1
jax: 0.10.0
libtpu: 0.0.40
codegen_flags: <defaults>
</compile_context>

<pallas_src>
import functools

import jax
import jax.numpy as jnp
from jax.experimental import pallas as pl
from jax.experimental.pallas import tpu as pltpu


# ----------------------------- helpers -------------------------------------


def _nbytes(shape, dtype):
    n = 1
    for s in shape:
        n *= int(s)
    return n * jnp.dtype(dtype).itemsize


def _vmem_limit(estimate_bytes):
    # Generous headroom over the analytic estimate, floored at 16 MiB and capped at
    # 64 MiB (smallest physical VMEM across v5e/v6e/v7x) so the request is always legal.
    return int(min(max(2 * estimate_bytes + (4 << 20), 16 << 20), 64 << 20))


def _const_spec(arr, grid_ndim):
    # Constant block index across the whole grid -> fetched once, stays resident in VMEM.
    # Single-buffered: no point double-buffering a block whose index never changes.
    nd = arr.ndim
    zeros = (0,) * nd
    index_map = {2: (lambda b, k: zeros), 3: (lambda b, q, k: zeros)}[grid_ndim]
    return pl.BlockSpec(arr.shape, index_map, pipeline_mode=pl.Buffered(1))


# ------------------------- kernel 1: K/V projection -------------------------


def _kv_proj_kernel(xkv_ref, wk_ref, bk_ref, wv_ref, bv_ref, kh_ref, vh_ref,
                    *, num_heads, head_dim):
    xkv = xkv_ref[0]                                             # (TKV, D)
    tkv = xkv.shape[0]
    cdt = wk_ref.dtype                                           # MXU input dtype (f32 or bf16)
    xkv_c = xkv.astype(cdt)
    k = jnp.dot(xkv_c, wk_ref[...], preferred_element_type=jnp.float32) + bk_ref[...]
    v = jnp.dot(xkv_c, wv_ref[...], preferred_element_type=jnp.float32) + bv_ref[...]
    # Head layout (H, TKV, Dh); lane axis stays intact when Dh is a multiple of 128.
    kh_ref[0] = k.reshape(tkv, num_heads, head_dim).transpose(1, 0, 2).astype(kh_ref.dtype)
    vh_ref[0] = v.reshape(tkv, num_heads, head_dim).transpose(1, 0, 2).astype(vh_ref.dtype)


def kv_project(x_kv, params, num_heads, *, block_kv):
    B, Nkv, D = x_kv.shape
    inner = params["wk"].shape[1]
    head_dim = inner // num_heads
    tkv = min(block_kv, Nkv)
    assert Nkv % tkv == 0, "Nkv must be divisible by the kv tile size"

    # K/V carried at the weight dtype (bf16 if weights were pre-cast, else input dtype).
    kv_dtype = params["wk"].dtype if params["wk"].dtype != jnp.float32 else x_kv.dtype

    est = (2 * _nbytes((D, inner), params["wk"].dtype)           # wk, wv (single-buffered)
           + 2 * _nbytes((1, inner), params["bk"].dtype)
           + 2 * _nbytes((1, tkv, D), x_kv.dtype)                # x_kv tile, double-buffered
           + 4 * _nbytes((1, num_heads, tkv, head_dim), kv_dtype)  # kh/vh outs, 2 buffers each
           + 2 * _nbytes((tkv, inner), jnp.float32))             # f32 matmul results

    kernel = functools.partial(_kv_proj_kernel, num_heads=num_heads, head_dim=head_dim)
    out_sd = jax.ShapeDtypeStruct((B, num_heads, Nkv, head_dim), kv_dtype)

    return pl.pallas_call(
        kernel,
        out_shape=(out_sd, out_sd),
        grid=(B, Nkv // tkv),
        in_specs=[
            pl.BlockSpec((1, tkv, D), lambda b, ki: (b, ki, 0)),
            _const_spec(params["wk"], 2), _const_spec(params["bk"], 2),
            _const_spec(params["wv"], 2), _const_spec(params["bv"], 2),
        ],
        out_specs=(
            pl.BlockSpec((1, num_heads, tkv, head_dim), lambda b, ki: (b, 0, ki, 0)),
            pl.BlockSpec((1, num_heads, tkv, head_dim), lambda b, ki: (b, 0, ki, 0)),
        ),
        compiler_params=pltpu.CompilerParams(
            dimension_semantics=("parallel", "parallel"),
            vmem_limit_bytes=_vmem_limit(est)),
    )(x_kv, params["wk"], params["bk"], params["wv"], params["bv"])


# --------------- kernel 2: attention + out-proj + LayerNorm + residual -------


def _attn_kernel(xq_ref, kh_ref, vh_ref,
                 wq_ref, bq_ref, wo_ref, bo_ref, gamma_ref, beta_ref,
                 out_ref,
                 q_scr, m_scr, l_scr, acc_scr,
                 *, num_heads, head_dim):
    ki = pl.program_id(2)
    nk = pl.num_programs(2)
    cdt = wq_ref.dtype

    @pl.when(ki == 0)
    def _init():
        xq = xq_ref[0]                                           # (TQ, D)
        tq = xq.shape[0]
        # wq/bq already carry the 1/sqrt(Dh) softmax scale (folded at prep time).
        q = jnp.dot(xq.astype(cdt), wq_ref[...],
                    preferred_element_type=jnp.float32) + bq_ref[...]
        qh = q.reshape(tq, num_heads, head_dim).transpose(1, 0, 2)   # (H, TQ, Dh)
        q_scr[...] = qh.astype(q_scr.dtype)
        m_scr[...] = jnp.full(m_scr.shape, -jnp.inf, m_scr.dtype)
        l_scr[...] = jnp.zeros(l_scr.shape, l_scr.dtype)
        acc_scr[...] = jnp.zeros(acc_scr.shape, acc_scr.dtype)

    kh = kh_ref[0]                                               # (H, TKV, Dh)
    vh = vh_ref[0]
    # Head-batched score matmul, no explicit K transpose; f32 accumulation on the MXU.
    s = jnp.einsum('hqd,hkd->hqk', q_scr[...], kh.astype(q_scr.dtype),
                   preferred_element_type=jnp.float32)           # (H, TQ, TKV)
    m_prev = m_scr[...]
    m_new = jnp.maximum(m_prev, jnp.max(s, axis=-1, keepdims=True))
    alpha = jnp.exp(m_prev - m_new)
    p = jnp.exp(s - m_new)
    l_scr[...] = alpha * l_scr[...] + jnp.sum(p, axis=-1, keepdims=True)
    acc_scr[...] = alpha * acc_scr[...] + jnp.einsum(
        'hqk,hkd->hqd', p.astype(vh.dtype), vh, preferred_element_type=jnp.float32)
    m_scr[...] = m_new

    @pl.when(ki == nk - 1)
    def _finalize():
        xq = xq_ref[0]
        tq = xq.shape[0]
        # Approximate EUP reciprocal (small deviation vs exact division; fine for inference).
        ctx = acc_scr[...] * pl.reciprocal(l_scr[...], approx=True)   # (H, TQ, Dh)
        attn = ctx.transpose(1, 0, 2).reshape(tq, num_heads * head_dim)
        o = jnp.dot(attn.astype(cdt), wo_ref[...],
                    preferred_element_type=jnp.float32) + bo_ref[...]
        # LayerNorm over the last dim, eps = 1e-6 (f32).
        mu = jnp.mean(o, axis=-1, keepdims=True)
        var = jnp.mean(jnp.square(o - mu), axis=-1, keepdims=True)
        normed = (o - mu) * jax.lax.rsqrt(var + 1e-6)
        normed = normed * gamma_ref[...] + beta_ref[...]
        out_ref[0] = (xq.astype(jnp.float32) + normed).astype(out_ref.dtype)


def crossattn(x_q, x_kv, params, num_heads, *, block_q=256, block_kv=256):
    """Cross-attention + LayerNorm + residual.

    `params` must come from prepare_params() (softmax scale already folded into wq/bq,
    weights optionally pre-cast to bf16).  Use block_q=block_kv=128 on v5e; defaults of
    256 match the 256-wide MXUs on v6e/v7x.
    """
    B, Nq, D = x_q.shape
    _, Nkv, _ = x_kv.shape
    inner = params["wq"].shape[1]
    head_dim = inner // num_heads

    tq = min(block_q, Nq)
    tkv = min(block_kv, Nkv)
    assert Nq % tq == 0, "Nq must be divisible by the query tile size"
    assert Nkv % tkv == 0, "Nkv must be divisible by the kv tile size"

    # K/V projections + head relayout computed once (not per query tile).
    kh, vh = kv_project(x_kv, params, num_heads, block_kv=tkv)

    cdt = params["wq"].dtype
    kernel = functools.partial(_attn_kernel, num_heads=num_heads, head_dim=head_dim)

    est = (_nbytes((D, inner), params["wq"].dtype)               # wq (single-buffered)
           + _nbytes((inner, D), params["wo"].dtype)             # wo
           + _nbytes((1, inner), jnp.float32) + 3 * _nbytes((1, D), jnp.float32)
           + 2 * _nbytes((1, tq, D), x_q.dtype)                  # x_q tile, 2 buffers
           + 4 * _nbytes((1, num_heads, tkv, head_dim), kh.dtype)  # kh/vh tiles, 2 buffers each
           + 2 * _nbytes((1, tq, D), x_q.dtype)                  # out tile, 2 buffers
           + _nbytes((num_heads, tq, head_dim), cdt)             # q scratch
           + 2 * _nbytes((num_heads, tq, 128), jnp.float32)      # m, l (lane-padded)
           + _nbytes((num_heads, tq, head_dim), jnp.float32)     # acc
           + 2 * _nbytes((num_heads, tq, tkv), jnp.float32))     # s, p transients

    return pl.pallas_call(
        kernel,
        out_shape=jax.ShapeDtypeStruct((B, Nq, D), x_q.dtype),
        grid=(B, Nq // tq, Nkv // tkv),
        in_specs=[
            pl.BlockSpec((1, tq, D), lambda b, qi, ki: (b, qi, 0)),                 # x_q (resident over ki)
            pl.BlockSpec((1, num_heads, tkv, head_dim), lambda b, qi, ki: (b, 0, ki, 0)),  # K heads
            pl.BlockSpec((1, num_heads, tkv, head_dim), lambda b, qi, ki: (b, 0, ki, 0)),  # V heads
            _const_spec(params["wq"], 3), _const_spec(params["bq"], 3),
            _const_spec(params["wo"], 3), _const_spec(params["bo"], 3),
            _const_spec(params["gamma"], 3), _const_spec(params["beta"], 3),
        ],
        out_specs=pl.BlockSpec((1, tq, D), lambda b, qi, ki: (b, qi, 0)),
        scratch_shapes=[
            pltpu.VMEM((num_heads, tq, head_dim), cdt),          # q in head layout
            pltpu.VMEM((num_heads, tq, 1), jnp.float32),         # running max
            pltpu.VMEM((num_heads, tq, 1), jnp.float32),         # running sum
            pltpu.VMEM((num_heads, tq, head_dim), jnp.float32),  # running context accumulator
        ],
        compiler_params=pltpu.CompilerParams(
            dimension_semantics=("parallel", "parallel", "arbitrary"),
            vmem_limit_bytes=_vmem_limit(est)),
    )(x_q, kh, vh,
      params["wq"], params["bq"], params["wo"], params["bo"],
      params["gamma"], params["beta"])


# ------------------------------ parameters ----------------------------------


def init_params(key, d_model, num_heads):
    head_dim = d_model // num_heads
    inner = num_heads * head_dim
    ks = jax.random.split(key, 4)
    sc = 0.02
    return {
        "wq": sc * jax.random.normal(ks[0], (d_model, inner), jnp.float32),
        "bq": jnp.zeros((1, inner), jnp.float32),
        "wk": sc * jax.random.normal(ks[1], (d_model, inner), jnp.float32),
        "bk": jnp.zeros((1, inner), jnp.float32),
        "wv": sc * jax.random.normal(ks[2], (d_model, inner), jnp.float32),
        "bv": jnp.zeros((1, inner), jnp.float32),
        "wo": sc * jax.random.normal(ks[3], (inner, d_model), jnp.float32),
        "bo": jnp.zeros((1, d_model), jnp.float32),
        "gamma": jnp.ones((1, d_model), jnp.float32),
        "beta": jnp.zeros((1, d_model), jnp.float32),
    }


def prepare_params(params, num_heads, *, mxu_dtype=None):
    """One-time parameter transform:
       * fold the 1/sqrt(head_dim) softmax scale into (wq, bq)
       * optionally pre-cast the matmul weights to `mxu_dtype` (e.g. jnp.bfloat16)
         so no per-step casting / double-width weight DMA happens inside the kernels.
       Biases / LayerNorm params stay in f32 (added to f32 accumulators)."""
    inner = params["wq"].shape[1]
    head_dim = inner // num_heads
    scale = float(head_dim) ** -0.5
    p = dict(params)
    p["wq"] = params["wq"] * scale
    p["bq"] = params["bq"] * scale
    if mxu_dtype is not None:
        for name in ("wq", "wk", "wv", "wo"):
            p[name] = p[name].astype(mxu_dtype)
    return p


# --------------------------------- demo -------------------------------------


if __name__ == "__main__":
    # Small config with head_dim = 128 (lane-dense head layout, per review);
    # block_q=128 / block_kv=64 exercise the (B, Nq/TQ, Nkv/TKV) grid + online softmax.
    B, Nq, Nkv, d_model, num_heads = 2, 256, 128, 256, 2

    key = jax.random.PRNGKey(0)
    kq, kkv, kp = jax.random.split(key, 3)
    x_q = jax.random.normal(kq, (B, Nq, d_model), jnp.float32)
    x_kv = jax.random.normal(kkv, (B, Nkv, d_model), jnp.float32)

    params = prepare_params(init_params(kp, d_model, num_heads), num_heads)
    # For bf16 MXU inputs on v6e/v7x:  prepare_params(..., mxu_dtype=jnp.bfloat16)

    out = crossattn(x_q, x_kv, params, num_heads, block_q=128, block_kv=64)
    jax.block_until_ready(out)
    assert out.shape == (B, Nq, d_model)
    print("KERNEL_OK")
</pallas_src>

<mosaic_0001>
module attributes {stable_mosaic.version = 11 : i64} {
  func.func @_kv_proj_kernel(%arg0: i32, %arg1: i32, %arg2: memref<1x64x256xf32, #tpu.memory_space<vmem>>, %arg3: memref<256x256xf32, #tpu.memory_space<vmem>>, %arg4: memref<1x256xf32, #tpu.memory_space<vmem>>, %arg5: memref<256x256xf32, #tpu.memory_space<vmem>>, %arg6: memref<1x256xf32, #tpu.memory_space<vmem>>, %arg7: memref<1x2x64x128xf32, #tpu.memory_space<vmem>>, %arg8: memref<1x2x64x128xf32, #tpu.memory_space<vmem>>) attributes {dimension_semantics = [#tpu.dimension_semantics<parallel>, #tpu.dimension_semantics<parallel>], iteration_bounds = array<i64: 2, 2>, scalar_prefetch = 0 : i64, scratch_operands = 0 : i64, tpu.core_type = #tpu.core_type<tc>, window_params = [{transform_indices = @transform_0, window_bounds = array<i64: 1, 64, 256>}, {pipeline_mode = #tpu.pipeline_mode<synchronous>, transform_indices = @transform_1, window_bounds = array<i64: 256, 256>}, {pipeline_mode = #tpu.pipeline_mode<synchronous>, transform_indices = @transform_2, window_bounds = array<i64: 1, 256>}, {pipeline_mode = #tpu.pipeline_mode<synchronous>, transform_indices = @transform_3, window_bounds = array<i64: 256, 256>}, {pipeline_mode = #tpu.pipeline_mode<synchronous>, transform_indices = @transform_4, window_bounds = array<i64: 1, 256>}, {transform_indices = @transform_5, window_bounds = array<i64: 1, 2, 64, 128>}, {transform_indices = @transform_6, window_bounds = array<i64: 1, 2, 64, 128>}]} {
    %c0 = arith.constant 0 : index
    %c0_0 = arith.constant 0 : index
    %c0_1 = arith.constant 0 : index
    %0 = vector.load %arg2[%c0, %c0_0, %c0_1] : memref<1x64x256xf32, #tpu.memory_space<vmem>>, vector<1x64x256xf32>
    %1 = vector.shape_cast %0 : vector<1x64x256xf32> to vector<64x256xf32>
    %c0_2 = arith.constant 0 : index
    %c0_3 = arith.constant 0 : index
    %2 = vector.load %arg3[%c0_2, %c0_3] : memref<256x256xf32, #tpu.memory_space<vmem>>, vector<256x256xf32>
    %cst = arith.constant dense<0.000000e+00> : vector<64x256xf32>
    %3 = tpu.matmul %1, %2, %cst {dimension_numbers = #tpu.dot_dimension_numbers<[1], [0], [0], [1], [0, 0, 1, 1], [], []>} : vector<64x256xf32>, vector<256x256xf32>, vector<64x256xf32> -> vector<64x256xf32>
    %c0_4 = arith.constant 0 : index
    %c0_5 = arith.constant 0 : index
    %4 = vector.load %arg4[%c0_4, %c0_5] : memref<1x256xf32, #tpu.memory_space<vmem>>, vector<1x256xf32>
    %5 = vector.broadcast %4 : vector<1x256xf32> to vector<64x256xf32>
    %6 = arith.addf %3, %5 : vector<64x256xf32>
    %c0_6 = arith.constant 0 : index
    %c0_7 = arith.constant 0 : index
    %7 = vector.load %arg5[%c0_6, %c0_7] : memref<256x256xf32, #tpu.memory_space<vmem>>, vector<256x256xf32>
    %cst_8 = arith.constant dense<0.000000e+00> : vector<64x256xf32>
    %8 = tpu.matmul %1, %7, %cst_8 {dimension_numbers = #tpu.dot_dimension_numbers<[1], [0], [0], [1], [0, 0, 1, 1], [], []>} : vector<64x256xf32>, vector<256x256xf32>, vector<64x256xf32> -> vector<64x256xf32>
    %c0_9 = arith.constant 0 : index
    %c0_10 = arith.constant 0 : index
    %9 = vector.load %arg6[%c0_9, %c0_10] : memref<1x256xf32, #tpu.memory_space<vmem>>, vector<1x256xf32>
    %10 = vector.broadcast %9 : vector<1x256xf32> to vector<64x256xf32>
    %11 = arith.addf %8, %10 : vector<64x256xf32>
    %12 = vector.shape_cast %6 : vector<64x256xf32> to vector<64x2x128xf32>
    %13 = tpu.transpose %12, [1, 0, 2] : vector<64x2x128xf32> -> vector<2x64x128xf32>
    %c0_11 = arith.constant 0 : index
    %c0_12 = arith.constant 0 : index
    %c0_13 = arith.constant 0 : index
    %c0_14 = arith.constant 0 : index
    %14 = vector.load %arg7[%c0_11, %c0_12, %c0_13, %c0_14] : memref<1x2x64x128xf32, #tpu.memory_space<vmem>>, vector<1x2x64x128xf32>
    %15 = vector.shape_cast %14 : vector<1x2x64x128xf32> to vector<2x64x128xf32>
    %16 = vector.shape_cast %13 : vector<2x64x128xf32> to vector<1x2x64x128xf32>
    tpu.vector_store %arg7[%c0_11, %c0_12, %c0_13, %c0_14], %16 {strides = array<i32>} : memref<1x2x64x128xf32, #tpu.memory_space<vmem>>, vector<1x2x64x128xf32>,
    %17 = vector.shape_cast %11 : vector<64x256xf32> to vector<64x2x128xf32>
    %18 = tpu.transpose %17, [1, 0, 2] : vector<64x2x128xf32> -> vector<2x64x128xf32>
    %c0_15 = arith.constant 0 : index
    %c0_16 = arith.constant 0 : index
    %c0_17 = arith.constant 0 : index
    %c0_18 = arith.constant 0 : index
    %19 = vector.load %arg8[%c0_15, %c0_16, %c0_17, %c0_18] : memref<1x2x64x128xf32, #tpu.memory_space<vmem>>, vector<1x2x64x128xf32>
    %20 = vector.shape_cast %19 : vector<1x2x64x128xf32> to vector<2x64x128xf32>
    %21 = vector.shape_cast %18 : vector<2x64x128xf32> to vector<1x2x64x128xf32>
    tpu.vector_store %arg8[%c0_15, %c0_16, %c0_17, %c0_18], %21 {strides = array<i32>} : memref<1x2x64x128xf32, #tpu.memory_space<vmem>>, vector<1x2x64x128xf32>,
    return
  }
  func.func @transform_0(%arg0: i32, %arg1: i32) -> (i32, i32, i32) {
    %c0_i32 = arith.constant 0 : i32
    %c0_i32_0 = arith.constant 0 : i32
    return %arg0, %arg1, %c0_i32 : i32, i32, i32
  }
  func.func @transform_1(%arg0: i32, %arg1: i32) -> (i32, i32) {
    %c0_i32 = arith.constant 0 : i32
    %c0_i32_0 = arith.constant 0 : i32
    %c0_i32_1 = arith.constant 0 : i32
    return %c0_i32, %c0_i32_0 : i32, i32
  }
  func.func @transform_2(%arg0: i32, %arg1: i32) -> (i32, i32) {
    %c0_i32 = arith.constant 0 : i32
    %c0_i32_0 = arith.constant 0 : i32
    %c0_i32_1 = arith.constant 0 : i32
    return %c0_i32, %c0_i32_0 : i32, i32
  }
  func.func @transform_3(%arg0: i32, %arg1: i32) -> (i32, i32) {
    %c0_i32 = arith.constant 0 : i32
    %c0_i32_0 = arith.constant 0 : i32
    %c0_i32_1 = arith.constant 0 : i32
    return %c0_i32, %c0_i32_0 : i32, i32
  }
  func.func @transform_4(%arg0: i32, %arg1: i32) -> (i32, i32) {
    %c0_i32 = arith.constant 0 : i32
    %c0_i32_0 = arith.constant 0 : i32
    %c0_i32_1 = arith.constant 0 : i32
    return %c0_i32, %c0_i32_0 : i32, i32
  }
  func.func @transform_5(%arg0: i32, %arg1: i32) -> (i32, i32, i32, i32) {
    %c0_i32 = arith.constant 0 : i32
    %c0_i32_0 = arith.constant 0 : i32
    %c0_i32_1 = arith.constant 0 : i32
    return %arg0, %c0_i32, %arg1, %c0_i32_0 : i32, i32, i32, i32
  }
  func.func @transform_6(%arg0: i32, %arg1: i32) -> (i32, i32, i32, i32) {
    %c0_i32 = arith.constant 0 : i32
    %c0_i32_0 = arith.constant 0 : i32
    %c0_i32_1 = arith.constant 0 : i32
    return %arg0, %c0_i32, %arg1, %c0_i32_0 : i32, i32, i32, i32
  }
}

</mosaic_0001>

<bundles_post_ra>
// kernel: tpu_custom_call.1
= control target key start
LH: loop header
LB: loop body
LE: loop exit
PB: predicated region body
PF: predicated region fallthrough
CT: control target
= control target key end

     0   :  { %s4127_s0 = inlined_call_operand.hbm [shape: f32[2,128,256], index: 0, kind: input, shape index: {}]   ;;  %s4128_s1 = inlined_call_operand.hbm [shape: f32[256,256], index: 1, kind: input, shape index: {}]   ;;  %s4129_s2 = inlined_call_operand.vmem [shape: f32[1,256], index: 2, kind: input, shape index: {}]   ;;  %s4130_s3 = inlined_call_operand.hbm [shape: f32[256,256], index: 3, kind: input, shape index: {}]   ;;  %s4131_s4 = inlined_call_operand.vmem [shape: f32[1,256], index: 4, kind: input, shape index: {}]   ;;  %s4132_s5 = inlined_call_operand.hbm [shape: f32[2,2,128,128], index: 5, kind: output, shape index: {0}]   ;;  %s4133_s6 = inlined_call_operand.hbm [shape: f32[2,2,128,128], index: 6, kind: output, shape index: {1}]  }
   0x1   :  { %4145 = sst [smem:[#allocation23_spill]] %s4128_s1 }
   0x2   :  { %4146 = sst [smem:[#allocation24_spill]] %s4130_s3 }
   0x3   :  { %4147 = sst [smem:[#allocation25_spill]] %s4132_s5 }
   0x4   :  { %4148 = sst [smem:[#allocation26_spill]] %s4133_s6 }
   0x5   :  { %12 = vsyncpa [#allocation3], 0 }
   0x6   :  { %14 = vsyncpa [#allocation3 + $0x1], 0 }
   0x7   :  { %15 = vsyncpa [#allocation6], 0 }
   0x8   :  { %16 = vsyncpa [#allocation4], 0 }
   0x9   :  { %18 = vsyncpa [#allocation4 + $0x1], 0 }
   0xa   :  { %19 = vsyncpa [#allocation10], 0 }
   0xb   :  { %21 = vsyncpa [#allocation10 + $0x1], 0  ;;  %s3399_s21 = smov 0   ;;  %s3401_s22 = smov 0  }
   0xc   :  { %s3403_s23 = smov 0   ;;  %s3405_s24 = smov 0  }
   0xd   :  { %s3407_s25 = smov 0   ;;  %s3409_s26 = smov 0  }
   0xe   :  { %s3411_s27 = smov 0   ;;  %s3413_s28 = smov 0  }
   0xf LB: > { %4149 = sst [smem:[#allocation19_spill]] %s3314_s21  ;;  %s2857_s29 = sadd.s32 4294967295, %s3342_s28   ;;  %s3342_s28 = sphi %s3413_s28, %s27_s28   ;;  %s3338_s27 = sphi %s3411_s27, %s4183_s27   ;;  %s3334_s26 = sphi %s3409_s26, %s4182_s26   ;;  %s3330_s25 = sphi %s3407_s25, %s4181_s25   ;;  %s3326_s24 = sphi %s3405_s24, %s4180_s24   ;;  %s3322_s23 = sphi %s3403_s23, %s4179_s23   ;;  %s3318_s22 = sphi %s3401_s22, %s4178_s22   ;;  %s3314_s21 = sphi %s3399_s21, %s4177_s21  }
  0x10   : > { %s2858_s30 = sadd.s32 4294967294, %s3342_s28   ;;  %p61_p0 = scmp.ne.s32.totalorder %s3318_s22, %s3314_s21 }
  0x11   : > { %p3443_p1 = scmp.eq.s32.totalorder %s2857_s29, 0  ;;  %p3447_p2 = scmp.eq.s32.totalorder %s2857_s29, 3 }
  0x12   : > { %p177_p3 = scmp.eq.s32.totalorder %s2858_s30, 3  ;;  %p2859_p5 = scmp.ge.s32.totalorder %s3342_s28, 1 }
  0x13   : > { %s4150_s7 = scalar_select %p3443_p1, 1, 0 }
  0x14   : > { %s4151_s8 = scalar_select %p3447_p2, 1, 0 }
  0x15   : > { %p3453_p4 = por %p3443_p1, %p61_p0  ;;  %p3458_p6 = por %p177_p3, %p61_p0 }
  0x16   : > { %p212_p7 = scmp.lt.s32.totalorder %s3342_s28, 5  ;;  %s3344_s12 = smov [#allocation5]  }
  0x17   : > { %s4152_s9 = scalar_select %p3453_p4, 1, 0 }
  0x18   : > { %s4153_s10 = scalar_select %p3458_p6, 1, 0 }
  0x19   : > { %p3463_p8 = pnand %p2859_p5, %p212_p7  ;;  %s224_s13 = sshll.u32 %s3344_s12, 4  ;;  %s225_s13 = int_to_ptr.vmem [resolvable:$true] %s224_s13 }
  0x1a   : > { %4154 = sst [smem:[#allocation20_spill]] %s4153_s10  ;;  %s3345_s15 = smov [#allocation7]  }
  0x1b   : > { %s4155_s11 = scalar_select %p3463_p8, 1, 0 }
  0x1c   : > { %p3071_p9 = pneg %p3463_p8  ;;  %s240_s16 = sshll.u32 %s3345_s15, 4  ;;  %s3475_s16 = int_to_ptr.vmem [resolvable:$true] %s240_s16 }
  0x1d   : > { %s4157_s1 = sld [smem:[#allocation23_spill]] }
  0x1e   : > { %p3471_p10 = pnand %p3071_p9, %p3443_p1 }
  0x20   : > { %p3180_p12 = pneg %p3471_p10 }
  0x23   : > { %s3178_s19 = scalar_lea.hbm %s4157_s1, 8192 }
  0x24   : > { %p3179_p11 = scmp.ne.s32.totalorder %s4157_s1, %s3178_s19  ;;  %p3185_p3 = scmp.lt.u32.totalorder %s3178_s19, %s4157_s1 }
  0x26   : > { %p3181_p13 = pnand %p3180_p12, %p3179_p11 }
  0x28   : > { %p3182_p0 = pneg %p3181_p13 }
  0x2a   : > { %p3187_p5 = pnand %p3185_p3, %p3182_p0 }
  0x2c   : > { %3190 = shalt.err (!%p3187_p5)
}
  0x2d   : > { %s3191_s15 = scalar_lea.vmem %s225_s13, 8192  ;;  %p3199_p1 = scmp.lt.s32.totalorder %s225_s13, %s225_s13 }
  0x2e   : > { %p3192_p7 = scmp.ne.s32.totalorder %s225_s13, %s3191_s15  ;;  %p3200_p4 = scmp.lt.s32.totalorder %s3191_s15, %s3191_s15 }
  0x30   : > { %p3194_p9 = pnand %p3192_p7, %p3180_p12  ;;  %p3201_p8 = por %p3200_p4, %p3199_p1 }
  0x32   : > { %p3195_p6 = pneg %p3194_p9 }
  0x34   : > { %p3202_p2 = pnand %p3201_p8, %p3195_p6 }
  0x36   : > { %3205 = shalt.err (!%p3202_p2)
}
  0x37   : > { %s4140_s17 = smov 256   ;;  %s4141_s18 = smov 16  }
  0x38   : > { %3074 = dma.hbm_to_vmem [thread:$0]  (!%p3471_p10), %s4157_s1, 8192, %s225_s13, [#allocation6], %s4140_s17, %s4140_s17, %s4141_s18  }
  0x39   : > { %s4158_s3 = sld [smem:[#allocation24_spill]] }
  0x3f   : > { %s3206_s12 = scalar_lea.hbm %s4158_s3, 8192 }
  0x40   : > { %p3207_p1 = scmp.ne.s32.totalorder %s4158_s3, %s3206_s12  ;;  %p3213_p6 = scmp.lt.u32.totalorder %s3206_s12, %s4158_s3 }
  0x42   : > { %p3209_p2 = pnand %p3207_p1, %p3180_p12 }
  0x44   : > { %p3210_p4 = pneg %p3209_p2 }
  0x46   : > { %p3215_p8 = pnand %p3213_p6, %p3210_p4 }
  0x48   : > { %3218 = shalt.err (!%p3215_p8)
}
  0x49   : > { %s3219_s13 = scalar_lea.vmem %s3475_s16, 8192  ;;  %p3227_p3 = scmp.lt.s32.totalorder %s3475_s16, %s3475_s16 }
  0x4a   : > { %p3220_p11 = scmp.ne.s32.totalorder %s3475_s16, %s3219_s13  ;;  %p3228_p5 = scmp.lt.s32.totalorder %s3219_s13, %s3219_s13 }
  0x4c   : > { %p3222_p13 = pnand %p3220_p11, %p3180_p12  ;;  %p3229_p7 = por %p3228_p5, %p3227_p3 }
  0x4e   : > { %p3223_p0 = pneg %p3222_p13 }
  0x50   : > { %p3230_p9 = pnand %p3229_p7, %p3223_p0 }
  0x52   : > { %3233 = shalt.err (!%p3230_p9)
}
  0x53   : > { %3077 = dma.hbm_to_vmem [thread:$0]  (!%p3471_p10), %s4158_s3, 8192, %s3475_s16, [#allocation6], %s4140_s17, %s4140_s17, %s4141_s18  }
  0x54   : > { %s36_s10 = sadd.s32 1, %s3334_s26  ;;  %s39_s14 = sadd.s32 1, %s3338_s27 }
  0x55   : > { %p37_p12 = scmp.ge.s32.totalorder %s36_s10, 2  ;;  %s48_s19 = sadd.s32 1, %s3322_s23 }
  0x56   : > { %p55_p1 = scmp.ne.s32.totalorder %s3322_s23, %s3318_s22  ;;  %p56_p2 = scmp.eq.s32.totalorder %s3342_s28, 0 }
  0x57   : > { %s4185_s10 = smov (%p37_p12, %s36_s10), 0  ;;  %s4187_s14 = smov (!%p37_p12, %s39_s14), %s3338_s27 }
  0x58   : > { %4159 = sst [smem:[#allocation21_spill]] %s4185_s10  ;;  %s44_s20 = ssub.s32 %s3334_s26, %s4185_s10 }
  0x59   : > { %p3541_p4 = por %p56_p2, %p55_p1  ;;  %p41_p10 = scmp.ge.s32.totalorder %s4187_s14, 2 }
  0x5a   : > { %p4161_p6 = scmp.ne.s32.totalorder %s4151_s8, 0  ;;  %p3091_p11 = scmp.lt.s32.totalorder %s3342_s28, 4 }
  0x5b   : > { %s257_s30 = sand.u32 1, %s3322_s23   ;;  %s4189_s14 = smov (%p41_p10, %s4187_s14), 0 }
  0x5c   : > { %p3547_p8 = por %p4161_p6, %p55_p1  ;;  %s2863_s12 = sshll.u32 %s257_s30, 7 }
  0x5d   : > { %s43_s15 = ssub.s32 %s3338_s27, %s4189_s14  ;;  %s2916_s6 = sshll.u32 %s3334_s26, 4 }
  0x5e   : > { %s4162_s16 = scalar_select %p3547_p8, 1, 0 }
  0x5f   : > { %s45_s13 = sor.u32 %s44_s20, %s43_s15  ;;  %s2866_s21 = sshll.u32 %s3338_s27, 5 }
  0x60   : > { %4163 = sst [smem:[#allocation22_spill]] %s4162_s16  ;;  %p46_p13 = scmp.eq.s32.totalorder %s45_s13, 0 }
  0x61   : > { %s268_s17 = sadd.s32 %s2916_s6, %s2866_s21  ;;  %s261_s18 = scalar_lea.vmem [#allocation2], %s2863_s12 }
  0x62   : > { %s271_s8 = sshll.u32 %s261_s18, 4  ;;  %s2867_s3 = sshll.u32 %s268_s17, 7  ;;  %s3562_s8 = int_to_ptr.vmem [resolvable:$true] %s271_s8 }
  0x63   : > { %s3560_s1 = scalar_select %p46_p13, %s3322_s23, %s48_s19  }
  0x64   : > { %s3567_s16 = scalar_lea.hbm %s4127_s0, %s2867_s3  ;;  %p3573_p0 = pnand %p3091_p11, %p3541_p4 }
  0x65   : > { %s3577_s17 = scalar_lea.sflag [#allocation3], %s257_s30  ;;  %s3234_s18 = scalar_lea.hbm %s3567_s16, 2048 }
  0x66   : > { %p3235_p3 = scmp.ne.s32.totalorder %s3567_s16, %s3234_s18  ;;  %p3236_p5 = pneg %p3573_p0 }
  0x67   : > { %s3239_s10 = scalar_lea.hbm %s4127_s0, 8192  ;;  %p3240_p12 = scmp.lt.u32.totalorder %s3567_s16, %s4127_s0 }
  0x68   : > { %p3237_p7 = pnand %p3236_p5, %p3235_p3  ;;  %p3241_p1 = scmp.lt.u32.totalorder %s3239_s10, %s3234_s18 }
  0x69   : > { %p3243_p4 = scmp.lt.u32.totalorder %s3234_s18, %s3567_s16 }
  0x6a   : > { %p3238_p9 = pneg %p3237_p7  ;;  %p3242_p2 = por %p3241_p1, %p3240_p12 }
  0x6c   : > { %p3244_p10 = por %p3243_p4, %p3242_p2 }
  0x6e   : > { %p3245_p6 = pnand %p3244_p10, %p3238_p9 }
  0x70   : > { %3248 = shalt.err (!%p3245_p6)
}
  0x71   : > { %s3249_s30 = scalar_lea.vmem %s3562_s8, 2048  ;;  %s3348_s12 = smov [#allocation2]  }
  0x72   : > { %p3250_p11 = scmp.ne.s32.totalorder %s3562_s8, %s3249_s30  ;;  %s3254_s15 = sshll.u32 %s3348_s12, 4  ;;  %s3255_s15 = int_to_ptr.vmem [resolvable:$false] %s3254_s15 }
  0x73   : > { %s3256_s13 = scalar_lea.vmem %s3255_s15, 4096  ;;  %p3257_p7 = scmp.lt.s32.totalorder %s3562_s8, %s3255_s15 }
  0x74   : > { %p3252_p13 = pnand %p3250_p11, %p3236_p5  ;;  %p3258_p12 = scmp.lt.s32.totalorder %s3256_s13, %s3249_s30 }
  0x76   : > { %p3253_p3 = pneg %p3252_p13  ;;  %p3259_p1 = por %p3258_p12, %p3257_p7 }
  0x78   : > { %p3260_p2 = pnand %p3259_p1, %p3253_p3 }
  0x7a   : > { %3263 = shalt.err (!%p3260_p2)
}
  0x7b   : > { %s4165_s6 = smov 16   ;;  %s4166_s21 = smov 256  }
  0x7c   : > { %3081 = dma.hbm_to_vmem [thread:$0]  (!%p3573_p0), %s3567_s16, 2048, %s3562_s8, %s3577_s17, %s4166_s21, %s4166_s21, %s4165_s6  }
  0x7d   : > { %p4167_p5 = scmp.ne.s32.totalorder %s4155_s11, 0 }
  0x7e   : > { %s3611_s18 = sand.u32 (!%p4167_p5), 1, %s3318_s22   ;;  %p4168_p9 = scmp.ne.s32.totalorder (!%p4167_p5), %s4152_s9, 0 }
  0x7f   : > { %283 = sbr.rel (%p4167_p5) target bundleno = 570 (0x23a), region = 40  ;;  %s3614_s3 = sshll.u32 (!%p4167_p5), %s3611_s18, 7 }
  0x80   : > { %s286_s20 = scalar_lea.sflag (!%p4167_p5), [#allocation3], %s3611_s18  ;;  %s3618_s5 = scalar_lea.vmem (!%p4167_p5), [#allocation2], %s3614_s3 }
  0x86   : > { %3297 = dma.done.wait (%p4168_p9), %s286_s20, 2048  }
  0x87   : > { %3299 = vsyncadd (%p4168_p9), %s286_s20, 4294965248  ;;  %p4169_p0 = scmp.ne.s32.totalorder %s4150_s7, 0 }
  0x89   : > { %3301 = dma.done.wait (%p4169_p0), [#allocation6], 16384  }
  0x8a   : > { %3303 = vsyncadd (%p4169_p0), [#allocation6], 4294950912  ;;  %v351_v0 = vld [vmem:[#allocation5 + $0x8] sm:$0xff]  ;;  %v353_v1 = vld [vmem:[#allocation5 + $0x18] sm:$0xff]  ;;  %s3743_s8 = scalar_lea.vmem [#allocation8], %s3614_s3  ;;  %s3751_s17 = scalar_lea.vmem [#allocation9], %s3614_s3 }
  0x8b   : > { %v540_v2 = vld [vmem:[#allocation7 + $0x8] sm:$0xff]  ;;  %v2917_v3 = vpack.c.bf16 %v353_v1, %v351_v0  ;;  %v542_v4 = vld [vmem:[#allocation7 + $0x18] sm:$0xff]  ;;  %v350_v5 = vld [vmem:[#allocation5] sm:$0xff]  ;;  %s2617_s10 = scalar_lea.sflag [#allocation4], %s3611_s18  ;;  %s2622_s19 = scalar_lea.sflag [#allocation10], %s3611_s18 }
  0x8c   : > { %v352_v6 = vld [vmem:[#allocation5 + $0x10] sm:$0xff]  ;;  %v2981_v7 = vpack.c.bf16 %v542_v4, %v540_v2  ;;  %v539_v9 = vld [vmem:[#allocation7] sm:$0xff]  ;;  %v355_v11 = vld [vmem:[#allocation5 + $0x28] sm:$0xff] }
  0x8d   : > { %v2919_v8 = vpack.c.bf16 %v352_v6, %v350_v5  ;;  %v541_v10 = vld [vmem:[#allocation7 + $0x10] sm:$0xff]  ;;  %2918 = vmatprep.subr.bf16.mxu0 %v2917_v3  ;;  %v357_v13 = vld [vmem:[#allocation5 + $0x38] sm:$0xff]  ;;  %v544_v14 = vld [vmem:[#allocation7 + $0x28] sm:$0xff] }
  0x8e   : > { %v2983_v12 = vpack.c.bf16 %v541_v10, %v539_v9  ;;  %v546_v15 = vld [vmem:[#allocation7 + $0x38] sm:$0xff]  ;;  %2982 = vmatprep.subr.bf16.mxu1 %v2981_v7  ;;  %v2921_v16 = vpack.c.bf16 %v357_v13, %v355_v11  ;;  %v354_v18 = vld [vmem:[#allocation5 + $0x20] sm:$0xff]  ;;  %v356_v19 = vld [vmem:[#allocation5 + $0x30] sm:$0xff] }
  0x8f   : > { %2920 = vmatpush1.bf16.msra.mxu0 %v2919_v8  ;;  %v2985_v17 = vpack.c.bf16 %v546_v15, %v544_v14  ;;  %v543_v20 = vld [vmem:[#allocation7 + $0x20] sm:$0xff]  ;;  %v2923_v21 = vpack.c.bf16 %v356_v19, %v354_v18  ;;  %v545_v22 = vld [vmem:[#allocation7 + $0x30] sm:$0xff]  ;;  %v359_v23 = vld [vmem:[#allocation5 + $0x48] sm:$0xff] }
  0x90   : > { %2984 = vmatpush1.bf16.msra.mxu1 %v2983_v12  ;;  %v361_v24 = vld [vmem:[#allocation5 + $0x58] sm:$0xff]  ;;  %2922 = vmatprep.subr.bf16.mxu0 %v2921_v16  ;;  %v2987_v25 = vpack.c.bf16 %v545_v22, %v543_v20  ;;  %v548_v27 = vld [vmem:[#allocation7 + $0x48] sm:$0xff]  ;;  %v358_v29 = vld [vmem:[#allocation5 + $0x40] sm:$0xff] }
  0x91   : > { %2986 = vmatprep.subr.bf16.mxu1 %v2985_v17  ;;  %v2925_v26 = vpack.c.bf16 %v361_v24, %v359_v23  ;;  %v550_v28 = vld [vmem:[#allocation7 + $0x58] sm:$0xff]  ;;  %v360_v31 = vld [vmem:[#allocation5 + $0x50] sm:$0xff]  ;;  %v547_v32 = vld [vmem:[#allocation7 + $0x40] sm:$0xff] }
  0x92   : > { %v2989_v30 = vpack.c.bf16 %v550_v28, %v548_v27  ;;  %v549_v33 = vld [vmem:[#allocation7 + $0x50] sm:$0xff]  ;;  %v2927_v34 = vpack.c.bf16 %v360_v31, %v358_v29  ;;  %v363_v35 = vld [vmem:[#allocation5 + $0x68] sm:$0xff]  ;;  %v365_v36 = vld [vmem:[#allocation5 + $0x78] sm:$0xff] }
  0x93   : > { %2924 = vmatpush1.bf16.msra.mxu0 %v2923_v21  ;;  %v552_v37 = vld [vmem:[#allocation7 + $0x68] sm:$0xff]  ;;  %v2991_v38 = vpack.c.bf16 %v549_v33, %v547_v32  ;;  %v2929_v39 = vpack.c.bf16 %v365_v36, %v363_v35  ;;  %v554_v40 = vld [vmem:[#allocation7 + $0x78] sm:$0xff]  ;;  %v362_v41 = vld [vmem:[#allocation5 + $0x60] sm:$0xff] }
  0x94   : > { %2988 = vmatpush1.bf16.msra.mxu1 %v2987_v25  ;;  %2926 = vmatprep.subr.bf16.mxu0 %v2925_v26  ;;  %v364_v42 = vld [vmem:[#allocation5 + $0x70] sm:$0xff]  ;;  %v2993_v43 = vpack.c.bf16 %v554_v40, %v552_v37  ;;  %v551_v44 = vld [vmem:[#allocation7 + $0x60] sm:$0xff]  ;;  %v367_v46 = vld [vmem:[#allocation5 + $0x88] sm:$0xff] }
  0x95   : > { %2990 = vmatprep.subr.bf16.mxu1 %v2989_v30  ;;  %v553_v45 = vld [vmem:[#allocation7 + $0x70] sm:$0xff]  ;;  %v369_v47 = vld [vmem:[#allocation5 + $0x98] sm:$0xff]  ;;  %v556_v48 = vld [vmem:[#allocation7 + $0x88] sm:$0xff]  ;;  %v2931_v50 = vpack.c.bf16 %v364_v42, %v362_v41 }
  0x96   : > { %v558_v49 = vld [vmem:[#allocation7 + $0x98] sm:$0xff]  ;;  %v2995_v51 = vpack.c.bf16 %v553_v45, %v551_v44  ;;  %v2933_v52 = vpack.c.bf16 %v369_v47, %v367_v46  ;;  %v366_v53 = vld [vmem:[#allocation5 + $0x80] sm:$0xff]  ;;  %v368_v54 = vld [vmem:[#allocation5 + $0x90] sm:$0xff] }
  0x97   : > { %2928 = vmatpush1.bf16.msra.mxu0 %v2927_v34  ;;  %v555_v55 = vld [vmem:[#allocation7 + $0x80] sm:$0xff]  ;;  %v2997_v56 = vpack.c.bf16 %v558_v49, %v556_v48  ;;  %v557_v57 = vld [vmem:[#allocation7 + $0x90] sm:$0xff]  ;;  %v371_v58 = vld [vmem:[#allocation5 + $0xa8] sm:$0xff]  ;;  %v2935_v62 = vpack.c.bf16 %v368_v54, %v366_v53 }
  0x98   : > { %2992 = vmatpush1.bf16.msra.mxu1 %v2991_v38  ;;  %2930 = vmatprep.subr.bf16.mxu0 %v2929_v39  ;;  %v373_v59 = vld [vmem:[#allocation5 + $0xb8] sm:$0xff]  ;;  %v560_v60 = vld [vmem:[#allocation7 + $0xa8] sm:$0xff]  ;;  %v2999_v63 = vpack.c.bf16 %v557_v57, %v555_v55  ;;  %v370_v1 = vld [vmem:[#allocation5 + $0xa0] sm:$0xff] }
  0x99   : > { %2994 = vmatprep.subr.bf16.mxu1 %v2993_v43  ;;  %v562_v61 = vld [vmem:[#allocation7 + $0xb8] sm:$0xff]  ;;  %v2937_v0 = vpack.c.bf16 %v373_v59, %v371_v58  ;;  %v372_v2 = vld [vmem:[#allocation5 + $0xb0] sm:$0xff]  ;;  %v559_v3 = vld [vmem:[#allocation7 + $0xa0] sm:$0xff] }
  0x9a   : > { %v3001_v4 = vpack.c.bf16 %v562_v61, %v560_v60  ;;  %v561_v5 = vld [vmem:[#allocation7 + $0xb0] sm:$0xff]  ;;  %v375_v6 = vld [vmem:[#allocation5 + $0xc8] sm:$0xff]  ;;  %v377_v7 = vld [vmem:[#allocation5 + $0xd8] sm:$0xff]  ;;  %v2939_v10 = vpack.c.bf16 %v372_v2, %v370_v1 }
  0x9b   : > { %2932 = vmatpush1.bf16.msra.mxu0 %v2931_v50  ;;  %v564_v8 = vld [vmem:[#allocation7 + $0xc8] sm:$0xff]  ;;  %v566_v9 = vld [vmem:[#allocation7 + $0xd8] sm:$0xff]  ;;  %v3003_v11 = vpack.c.bf16 %v561_v5, %v559_v3  ;;  %v2941_v12 = vpack.c.bf16 %v377_v7, %v375_v6  ;;  %v374_v13 = vld [vmem:[#allocation5 + $0xc0] sm:$0xff] }
  0x9c   : > { %2996 = vmatpush1.bf16.msra.mxu1 %v2995_v51  ;;  %2934 = vmatprep.subr.bf16.mxu0 %v2933_v52  ;;  %v376_v14 = vld [vmem:[#allocation5 + $0xd0] sm:$0xff]  ;;  %v563_v15 = vld [vmem:[#allocation7 + $0xc0] sm:$0xff]  ;;  %v3005_v16 = vpack.c.bf16 %v566_v9, %v564_v8  ;;  %v379_v18 = vld [vmem:[#allocation5 + $0xe8] sm:$0xff] }
  0x9d   : > { %2998 = vmatprep.subr.bf16.mxu1 %v2997_v56  ;;  %v565_v17 = vld [vmem:[#allocation7 + $0xd0] sm:$0xff]  ;;  %v381_v19 = vld [vmem:[#allocation5 + $0xf8] sm:$0xff]  ;;  %v568_v20 = vld [vmem:[#allocation7 + $0xe8] sm:$0xff]  ;;  %v2943_v22 = vpack.c.bf16 %v376_v14, %v374_v13 }
  0x9e   : > { %v570_v21 = vld [vmem:[#allocation7 + $0xf8] sm:$0xff]  ;;  %v3007_v23 = vpack.c.bf16 %v565_v17, %v563_v15  ;;  %v2945_v24 = vpack.c.bf16 %v381_v19, %v379_v18  ;;  %v378_v25 = vld [vmem:[#allocation5 + $0xe0] sm:$0xff]  ;;  %v380_v26 = vld [vmem:[#allocation5 + $0xf0] sm:$0xff] }
  0x9f   : > { %2936 = vmatpush1.bf16.msra.mxu0 %v2935_v62  ;;  %v567_v27 = vld [vmem:[#allocation7 + $0xe0] sm:$0xff]  ;;  %v3009_v28 = vpack.c.bf16 %v570_v21, %v568_v20  ;;  %v569_v29 = vld [vmem:[#allocation7 + $0xf0] sm:$0xff]  ;;  %v383_v30 = vld [vmem:[#allocation5 + $0x108] sm:$0xff]  ;;  %v2947_v34 = vpack.c.bf16 %v380_v26, %v378_v25 }
  0xa0   : > { %3000 = vmatpush1.bf16.msra.mxu1 %v2999_v63  ;;  %2938 = vmatprep.subr.bf16.mxu0 %v2937_v0  ;;  %v385_v31 = vld [vmem:[#allocation5 + $0x118] sm:$0xff]  ;;  %v572_v32 = vld [vmem:[#allocation7 + $0x108] sm:$0xff]  ;;  %v3011_v35 = vpack.c.bf16 %v569_v29, %v567_v27  ;;  %v382_v37 = vld [vmem:[#allocation5 + $0x100] sm:$0xff] }
  0xa1   : > { %3002 = vmatprep.subr.bf16.mxu1 %v3001_v4  ;;  %v574_v33 = vld [vmem:[#allocation7 + $0x118] sm:$0xff]  ;;  %v2949_v36 = vpack.c.bf16 %v385_v31, %v383_v30  ;;  %v384_v38 = vld [vmem:[#allocation5 + $0x110] sm:$0xff]  ;;  %v571_v39 = vld [vmem:[#allocation7 + $0x100] sm:$0xff] }
  0xa2   : > { %v3013_v40 = vpack.c.bf16 %v574_v33, %v572_v32  ;;  %v573_v41 = vld [vmem:[#allocation7 + $0x110] sm:$0xff]  ;;  %v387_v42 = vld [vmem:[#allocation5 + $0x128] sm:$0xff]  ;;  %v389_v43 = vld [vmem:[#allocation5 + $0x138] sm:$0xff]  ;;  %v2951_v46 = vpack.c.bf16 %v384_v38, %v382_v37 }
  0xa3   : > { %2940 = vmatpush1.bf16.msra.mxu0 %v2939_v10  ;;  %v576_v44 = vld [vmem:[#allocation7 + $0x128] sm:$0xff]  ;;  %v578_v45 = vld [vmem:[#allocation7 + $0x138] sm:$0xff]  ;;  %v3015_v47 = vpack.c.bf16 %v573_v41, %v571_v39  ;;  %v2953_v48 = vpack.c.bf16 %v389_v43, %v387_v42  ;;  %v386_v49 = vld [vmem:[#allocation5 + $0x120] sm:$0xff] }
  0xa4   : > { %3004 = vmatpush1.bf16.msra.mxu1 %v3003_v11  ;;  %2942 = vmatprep.subr.bf16.mxu0 %v2941_v12  ;;  %v388_v50 = vld [vmem:[#allocation5 + $0x130] sm:$0xff]  ;;  %v575_v51 = vld [vmem:[#allocation7 + $0x120] sm:$0xff]  ;;  %v3017_v52 = vpack.c.bf16 %v578_v45, %v576_v44  ;;  %v391_v54 = vld [vmem:[#allocation5 + $0x148] sm:$0xff] }
  0xa5   : > { %3006 = vmatprep.subr.bf16.mxu1 %v3005_v16  ;;  %v577_v53 = vld [vmem:[#allocation7 + $0x130] sm:$0xff]  ;;  %v393_v55 = vld [vmem:[#allocation5 + $0x158] sm:$0xff]  ;;  %v580_v56 = vld [vmem:[#allocation7 + $0x148] sm:$0xff]  ;;  %v2955_v58 = vpack.c.bf16 %v388_v50, %v386_v49 }
  0xa6   : > { %v582_v57 = vld [vmem:[#allocation7 + $0x158] sm:$0xff]  ;;  %v3019_v59 = vpack.c.bf16 %v577_v53, %v575_v51  ;;  %v2957_v60 = vpack.c.bf16 %v393_v55, %v391_v54  ;;  %v390_v61 = vld [vmem:[#allocation5 + $0x140] sm:$0xff]  ;;  %v392_v62 = vld [vmem:[#allocation5 + $0x150] sm:$0xff] }
  0xa7   : > { %2944 = vmatpush1.bf16.msra.mxu0 %v2943_v22  ;;  %v579_v63 = vld [vmem:[#allocation7 + $0x140] sm:$0xff]  ;;  %v3021_v0 = vpack.c.bf16 %v582_v57, %v580_v56  ;;  %v581_v1 = vld [vmem:[#allocation7 + $0x150] sm:$0xff]  ;;  %v395_v2 = vld [vmem:[#allocation5 + $0x168] sm:$0xff]  ;;  %v2959_v6 = vpack.c.bf16 %v392_v62, %v390_v61 }
  0xa8   : > { %3008 = vmatpush1.bf16.msra.mxu1 %v3007_v23  ;;  %2946 = vmatprep.subr.bf16.mxu0 %v2945_v24  ;;  %v397_v3 = vld [vmem:[#allocation5 + $0x178] sm:$0xff]  ;;  %v584_v4 = vld [vmem:[#allocation7 + $0x168] sm:$0xff]  ;;  %v394_v7 = vld [vmem:[#allocation5 + $0x160] sm:$0xff]  ;;  %v3023_v8 = vpack.c.bf16 %v581_v1, %v579_v63 }
  0xa9   : > { %3010 = vmatprep.subr.bf16.mxu1 %v3009_v28  ;;  %v586_v5 = vld [vmem:[#allocation7 + $0x178] sm:$0xff]  ;;  %v2961_v9 = vpack.c.bf16 %v397_v3, %v395_v2  ;;  %v396_v10 = vld [vmem:[#allocation5 + $0x170] sm:$0xff]  ;;  %v583_v11 = vld [vmem:[#allocation7 + $0x160] sm:$0xff] }
  0xaa   : > { %v585_v12 = vld [vmem:[#allocation7 + $0x170] sm:$0xff]  ;;  %v3025_v13 = vpack.c.bf16 %v586_v5, %v584_v4  ;;  %v399_v14 = vld [vmem:[#allocation5 + $0x188] sm:$0xff]  ;;  %v401_v15 = vld [vmem:[#allocation5 + $0x198] sm:$0xff]  ;;  %v2963_v19 = vpack.c.bf16 %v396_v10, %v394_v7 }
  0xab   : > { %2948 = vmatpush1.bf16.msra.mxu0 %v2947_v34  ;;  %v335_v16 = vld [vmem:[%s3618_s5 + $0x8] sm:$0xff]  ;;  %v590_v18 = vld [vmem:[#allocation7 + $0x198] sm:$0xff]  ;;  %v3027_v20 = vpack.c.bf16 %v585_v12, %v583_v11  ;;  %v2965_v21 = vpack.c.bf16 %v401_v15, %v399_v14  ;;  %v398_v22 = vld [vmem:[#allocation5 + $0x180] sm:$0xff] }
  0xac   : > { %3012 = vmatpush1.bf16.msra.mxu1 %v3011_v35  ;;  %2950 = vmatprep.subr.bf16.mxu0 %v2949_v36  ;;  %v588_v17 = vld [vmem:[#allocation7 + $0x188] sm:$0xff]  ;;  %v400_v23 = vld [vmem:[#allocation5 + $0x190] sm:$0xff]  ;;  %v587_v24 = vld [vmem:[#allocation7 + $0x180] sm:$0xff] }
  0xad   : > { %3014 = vmatprep.subr.bf16.mxu1 %v3013_v40  ;;  %490 = vmatprep.mubr.f32.mxu0 %v335_v16  ;;  %v3029_v25 = vpack.c.bf16 %v590_v18, %v588_v17  ;;  %v589_v26 = vld [vmem:[#allocation7 + $0x190] sm:$0xff]  ;;  %v403_v27 = vld [vmem:[#allocation5 + $0x1a8] sm:$0xff]  ;;  %v405_v28 = vld [vmem:[#allocation5 + $0x1b8] sm:$0xff]  ;;  %v2967_v31 = vpack.c.bf16 %v400_v23, %v398_v22  ;;  %v3349_v18 = vmov 1983009808  }
  0xae   : > { %679 = vmatprep.mubr.f32.mxu1 %v335_v16  ;;  %v592_v29 = vld [vmem:[#allocation7 + $0x1a8] sm:$0xff]  ;;  %v594_v30 = vld [vmem:[#allocation7 + $0x1b8] sm:$0xff]  ;;  %v3031_v32 = vpack.c.bf16 %v589_v26, %v587_v24  ;;  %v2969_v33 = vpack.c.bf16 %v405_v28, %v403_v27  ;;  %v402_v34 = vld [vmem:[#allocation5 + $0x1a0] sm:$0xff]  ;;  %v416_v16 = vlaneseq }
  0xaf   : > { %2952 = vmatpush1.bf16.msra.mxu0 %v2951_v46  ;;  %v404_v35 = vld [vmem:[#allocation5 + $0x1b0] sm:$0xff]  ;;  %v591_v36 = vld [vmem:[#allocation7 + $0x1a0] sm:$0xff]  ;;  %v3033_v37 = vpack.c.bf16 %v594_v30, %v592_v29  ;;  %v407_v39 = vld [vmem:[#allocation5 + $0x1c8] sm:$0xff] }
  0xb0   : > { %3016 = vmatpush1.bf16.msra.mxu1 %v3015_v47  ;;  %2954 = vmatprep.subr.bf16.mxu0 %v2953_v48  ;;  %v593_v38 = vld [vmem:[#allocation7 + $0x1b0] sm:$0xff]  ;;  %v409_v40 = vld [vmem:[#allocation5 + $0x1d8] sm:$0xff]  ;;  %v596_v41 = vld [vmem:[#allocation7 + $0x1c8] sm:$0xff]  ;;  %v2971_v43 = vpack.c.bf16 %v404_v35, %v402_v34  ;;  %v417_v17 = vshrl.u32 %v416_v16, 7 }
  0xb1   : > { %3018 = vmatprep.subr.bf16.mxu1 %v3017_v52  ;;  %v598_v42 = vld [vmem:[#allocation7 + $0x1d8] sm:$0xff]  ;;  %v3035_v44 = vpack.c.bf16 %v593_v38, %v591_v36  ;;  %v2973_v45 = vpack.c.bf16 %v409_v40, %v407_v39  ;;  %v406_v46 = vld [vmem:[#allocation5 + $0x1c0] sm:$0xff]  ;;  %v408_v47 = vld [vmem:[#allocation5 + $0x1d0] sm:$0xff]  ;;  %v3351_v40 = vmov 0.0  }
  0xb2   : > { %v595_v48 = vld [vmem:[#allocation7 + $0x1c0] sm:$0xff]  ;;  %v3037_v49 = vpack.c.bf16 %v598_v42, %v596_v41  ;;  %v597_v50 = vld [vmem:[#allocation7 + $0x1d0] sm:$0xff]  ;;  %v411_v51 = vld [vmem:[#allocation5 + $0x1e8] sm:$0xff]  ;;  %v2975_v55 = vpack.c.bf16 %v408_v47, %v406_v46  ;;  %v422_v22 = vsub.s32 1, %v417_v17 }
  0xb3   : > { %2956 = vmatpush1.bf16.msra.mxu0 %v2955_v58  ;;  %v413_v52 = vld [vmem:[#allocation5 + $0x1f8] sm:$0xff]  ;;  %v600_v53 = vld [vmem:[#allocation7 + $0x1e8] sm:$0xff]  ;;  %v3039_v56 = vpack.c.bf16 %v597_v50, %v595_v48  ;;  %v410_v58 = vld [vmem:[#allocation5 + $0x1e0] sm:$0xff] }
  0xb4   : > { %3020 = vmatpush1.bf16.msra.mxu1 %v3019_v59  ;;  %2958 = vmatprep.subr.bf16.mxu0 %v2957_v60  ;;  %v602_v54 = vld [vmem:[#allocation7 + $0x1f8] sm:$0xff]  ;;  %v2977_v57 = vpack.c.bf16 %v413_v52, %v411_v51  ;;  %v412_v59 = vld [vmem:[#allocation5 + $0x1f0] sm:$0xff]  ;;  %v599_v61 = vld [vmem:[#allocation7 + $0x1e0] sm:$0xff] }
  0xb5   : > { %3022 = vmatprep.subr.bf16.mxu1 %v3021_v0  ;;  %v3041_v60 = vpack.c.bf16 %v602_v54, %v600_v53  ;;  %v601_v62 = vld [vmem:[#allocation7 + $0x1f0] sm:$0xff]  ;;  %v2979_v63 = vpack.c.bf16 %v412_v59, %v410_v58  ;;  %v334_v1 = vld [vmem:[%s3618_s5] sm:$0xff]  ;;  %v337_v2 = vld [vmem:[%s3618_s5 + $0x18] sm:$0xff] }
  0xb6   : > { %v3043_v0 = vpack.c.bf16 %v601_v62, %v599_v61  ;;  %v336_v3 = vld [vmem:[%s3618_s5 + $0x10] sm:$0xff]  ;;  %v339_v4 = vld [vmem:[%s3618_s5 + $0x28] sm:$0xff]  ;;  %v338_v5 = vld [vmem:[%s3618_s5 + $0x20] sm:$0xff] }
  0xb7   : > { %2960 = vmatpush1.bf16.msra.mxu0 %v2959_v6  ;;  %v341_v6 = vld [vmem:[%s3618_s5 + $0x38] sm:$0xff]  ;;  %v340_v7 = vld [vmem:[%s3618_s5 + $0x30] sm:$0xff]  ;;  %v347_v12 = vld [vmem:[%s3618_s5 + $0x68] sm:$0xff] }
  0xb8   : > { %3024 = vmatpush1.bf16.msra.mxu1 %v3023_v8  ;;  %2962 = vmatprep.subr.bf16.mxu0 %v2961_v9  ;;  %v343_v8 = vld [vmem:[%s3618_s5 + $0x48] sm:$0xff]  ;;  %v342_v9 = vld [vmem:[%s3618_s5 + $0x40] sm:$0xff]  ;;  %v345_v10 = vld [vmem:[%s3618_s5 + $0x58] sm:$0xff] }
  0xb9   : > { %3026 = vmatprep.subr.bf16.mxu1 %v3025_v13  ;;  %v344_v11 = vld [vmem:[%s3618_s5 + $0x50] sm:$0xff]  ;;  %v346_v13 = vld [vmem:[%s3618_s5 + $0x60] sm:$0xff]  ;;  %v349_v14 = vld [vmem:[%s3618_s5 + $0x78] sm:$0xff] }
  0xba   : > { %v348_v15 = vld [vmem:[%s3618_s5 + $0x70] sm:$0xff]  ;;  %v603_v24 = vld [vmem:[%s4131_s4] sm:$0x3] }
  0xbb   : > { %2964 = vmatpush1.bf16.msra.mxu0 %v2963_v19  ;;  %v730_v19 = vunpack.c.l.s4 %v3349_v18 }
  0xbc   : > { %3028 = vmatpush1.bf16.msra.mxu1 %v3027_v20  ;;  %2966 = vmatprep.subr.bf16.mxu0 %v2965_v21  ;;  %v418_v20 = vsub.s32 0, %v417_v17  ;;  %v414_v21 = vld [vmem:[%s4129_s2] sm:$0x3] }
  0xbd   : > { %3030 = vmatprep.subr.bf16.mxu1 %v3029_v25  ;;  %v731_v23 = vunpack.c.0.s8 %v730_v19  ;;  %v3350_v25 = vmov 1934713408   ;;  %v3654_v29 = vrot.slane %v414_v21, %v422_v22 }
  0xbe   : > { %v761_v26 = vunpack.c.l.s4 %v3350_v25  ;;  %v3650_v27 = vrot.slane %v414_v21, %v418_v20  ;;  %v3652_v28 = vrot.slane %v603_v24, %v418_v20 }
  0xbf   : > { %2968 = vmatpush1.bf16.msra.mxu0 %v2967_v31  ;;  %v3656_v30 = vsub.s32 %v731_v23, %v417_v17 }
  0xc0   : > { %3032 = vmatpush1.bf16.msra.mxu1 %v3031_v32  ;;  %2970 = vmatprep.subr.bf16.mxu0 %v2969_v33  ;;  %v762_v31 = vunpack.c.0.s8 %v761_v26  ;;  %v3658_v32 = vrot.slane %v603_v24, %v422_v22 }
  0xc1   : > { %3034 = vmatprep.subr.bf16.mxu1 %v3033_v37 }
  0xc3   : > { %2972 = vmatpush1.bf16.msra.mxu0 %v2971_v43  ;;  %v3665_v43 = vsub.s32 %v762_v31, %v417_v17 }
  0xc4   : > { %3036 = vmatpush1.bf16.msra.mxu1 %v3035_v44  ;;  %2974 = vmatprep.subr.bf16.mxu0 %v2973_v45 }
  0xc5   : > { %3038 = vmatprep.subr.bf16.mxu1 %v3037_v49 }
  0xc7   : > { %2976 = vmatpush1.bf16.msra.mxu0 %v2975_v55 }
  0xc8   : > { %3040 = vmatpush1.bf16.msra.mxu1 %v3039_v56  ;;  %2978 = vmatprep.subr.bf16.mxu0 %v2977_v57 }
  0xc9   : > { %3042 = vmatprep.subr.bf16.mxu1 %v3041_v60 }
  0xcb   : > { %2980 = vmatpush1.bf16.msra.mxu0 %v2979_v63 }
  0xcc   : > { %3044 = vmatpush1.bf16.msra.mxu1 %v3043_v0 }
  0xce   : > { %491 = vmatmul.mubr.f32.vlgmr.msra.gmra.mrb[0].mxu0 %v334_v1 }
  0xcf   : > { %680 = vmatmul.mubr.f32.vlgmr.msra.gmra.mrb[0].mxu1 %v334_v1  ;;  %496 = vmatprep.mubr.f32.mxu0 %v337_v2 }
  0xd0   : > { %685 = vmatprep.mubr.f32.mxu1 %v337_v2 }
  0xd2   : > { %497 = vmatmul.mubr.f32.gmra.mrb[2].mxu0 %v336_v3 }
  0xd3   : > { %686 = vmatmul.mubr.f32.gmra.mrb[2].mxu1 %v336_v3  ;;  %502 = vmatprep.mubr.f32.mxu0 %v339_v4 }
  0xd4   : > { %691 = vmatprep.mubr.f32.mxu1 %v339_v4 }
  0xd6   : > { %503 = vmatmul.mubr.f32.gmra.mrb[4].mxu0 %v338_v5 }
  0xd7   : > { %692 = vmatmul.mubr.f32.gmra.mrb[4].mxu1 %v338_v5  ;;  %508 = vmatprep.mubr.f32.mxu0 %v341_v6 }
  0xd8   : > { %697 = vmatprep.mubr.f32.mxu1 %v341_v6 }
  0xda   : > { %509 = vmatmul.mubr.f32.gmra.mrb[6].mxu0 %v340_v7 }
  0xdb   : > { %698 = vmatmul.mubr.f32.gmra.mrb[6].mxu1 %v340_v7  ;;  %514 = vmatprep.mubr.f32.mxu0 %v343_v8 }
  0xdc   : > { %703 = vmatprep.mubr.f32.mxu1 %v343_v8 }
  0xde   : > { %515 = vmatmul.mubr.f32.gmra.mrb[8].mxu0 %v342_v9 }
  0xdf   : > { %704 = vmatmul.mubr.f32.gmra.mrb[8].mxu1 %v342_v9  ;;  %520 = vmatprep.mubr.f32.mxu0 %v345_v10 }
  0xe0   : > { %709 = vmatprep.mubr.f32.mxu1 %v345_v10 }
  0xe2   : > { %521 = vmatmul.mubr.f32.gmra.mrb[10].mxu0 %v344_v11 }
  0xe3   : > { %710 = vmatmul.mubr.f32.gmra.mrb[10].mxu1 %v344_v11  ;;  %526 = vmatprep.mubr.f32.mxu0 %v347_v12 }
  0xe4   : > { %715 = vmatprep.mubr.f32.mxu1 %v347_v12 }
  0xe6   : > { %527 = vmatmul.mubr.f32.gmra.mrb[12].mxu0 %v346_v13 }
  0xe7   : > { %716 = vmatmul.mubr.f32.gmra.mrb[12].mxu1 %v346_v13  ;;  %532 = vmatprep.mubr.f32.mxu0 %v349_v14 }
  0xe8   : > { %721 = vmatprep.mubr.f32.mxu1 %v349_v14 }
  0xea   : > { %533 = vmatmul.mubr.f32.gmra.mrb[14].mxu0 %v348_v15 }
  0xeb   : > { %722 = vmatmul.mubr.f32.gmra.mrb[14].mxu1 %v348_v15 }
 0x1a1   : > { %v492_v33 = vpop.f32.mrb[0].mxu0 }
 0x1a2   : > { %v493_v34 = vadd.f32 %v492_v33, %v3650_v27  ;;  %v681_v35 = vpop.f32.mrb[0].mxu1  ;;  %v494_v36 = vpop.f32.mrb[1].mxu0 }
 0x1a3   : > { %v682_v37 = vadd.f32 %v681_v35, %v3652_v28  ;;  %v495_v38 = vadd.f32 %v494_v36, %v3654_v29  ;;  %v683_v39 = vpop.f32.mrb[1].mxu1 }
 0x1a4   : > { %v728_v41 = vcombine.high %v493_v34, %v3351_v40  ;;  %v735_v42 = vrot.slane %v493_v34, %v3656_v30  ;;  %v684_v44 = vadd.f32 %v683_v39, %v3658_v32 }
 0x1a5   : > { %v1672_v45 = vcombine.high %v682_v37, %v3351_v40  ;;  %v1679_v46 = vrot.slane %v682_v37, %v3656_v30  ;;  %v743_v47 = vcombine.high %v495_v38, %v3351_v40  ;;  %v750_v48 = vrot.slane %v495_v38, %v3656_v30  ;;  %v498_v49 = vpop.f32.mrb[2].mxu0 }
 0x1a6   : > { %v742_v50 = vrot.slane %v728_v41, %v3656_v30  ;;  %v1687_v51 = vcombine.high %v684_v44, %v3351_v40  ;;  %v1694_v52 = vrot.slane %v684_v44, %v3656_v30  ;;  %v499_v53 = vadd.f32 %v498_v49, %v3650_v27  ;;  %v687_v54 = vpop.f32.mrb[2].mxu1  ;;  %v500_v55 = vpop.f32.mrb[3].mxu0 }
 0x1a7   : > { %v1686_v56 = vrot.slane %v1672_v45, %v3656_v30  ;;  %v757_v57 = vrot.slane %v743_v47, %v3656_v30  ;;  %v758_v58 = vcombine.low %v735_v42, %v750_v48  ;;  %v759_v59 = vcombine.high %v735_v42, %v750_v48  ;;  %v689_v60 = vpop.f32.mrb[3].mxu1 }
 0x1a8   : > { %v1701_v61 = vrot.slane %v1687_v51, %v3656_v30  ;;  %v1702_v62 = vcombine.low %v1679_v46, %v1694_v52  ;;  %v1703_v63 = vcombine.high %v1679_v46, %v1694_v52  ;;  %v794_v0 = vcombine.high %v499_v53, %v3351_v40 }
 0x1a9   : > { %v766_v1 = vrot.slane %v758_v58, %v3665_v43  ;;  %v773_v2 = vrot.slane %v759_v59, %v3665_v43  ;;  %v774_v3 = vcombine.low %v742_v50, %v757_v57  ;;  %v775_v4 = vcombine.high %v742_v50, %v757_v57  ;;  %v504_v5 = vpop.f32.mrb[4].mxu0 }
 0x1aa   : > { %v1710_v6 = vrot.slane %v1702_v62, %v3665_v43  ;;  %v1717_v7 = vrot.slane %v1703_v63, %v3665_v43  ;;  %v1718_v8 = vcombine.low %v1686_v56, %v1701_v61  ;;  %v1719_v9 = vcombine.high %v1686_v56, %v1701_v61  ;;  %v3684_v10 = vpop.f32.mrb[4].mxu1  ;;  %v3686_v11 = vpop.f32.mrb[5].mxu0 }
 0x1ab   : > { %v782_v12 = vrot.slane %v774_v3, %v3665_v43  ;;  %v789_v13 = vrot.slane %v775_v4, %v3665_v43  ;;  %v1256_v14 = vcombine.low %v766_v1, %v773_v2  ;;  %v2874_v15 = vcombine.high %v766_v1, %v773_v2  ;;  %v3690_v16 = vpop.f32.mrb[5].mxu1 }
 0x1ac   : > { %v1726_v17 = vrot.slane %v1718_v8, %v3665_v43  ;;  %v1733_v18 = vrot.slane %v1719_v9, %v3665_v43  ;;  %v2200_v19 = vcombine.low %v1710_v6, %v1717_v7  ;;  %v2890_v20 = vcombine.high %v1710_v6, %v1717_v7 }
 0x1ad   : > { %v1263_v21 = vrot.slane %v1256_v14, %v3656_v30  ;;  %v1271_v22 = vrot.slane %v2874_v15, %v3656_v30  ;;  %v1272_v23 = vcombine.low %v782_v12, %v789_v13  ;;  %v2875_v24 = vcombine.high %v782_v12, %v789_v13  ;;  %v3696_v25 = vpop.f32.mrb[6].mxu0 }
 0x1ae   : > { %v2207_v26 = vrot.slane %v2200_v19, %v3656_v30  ;;  %v2215_v31 = vrot.slane %v2890_v20, %v3656_v30  ;;  %v2216_v33 = vcombine.low %v1726_v17, %v1733_v18  ;;  %v2891_v34 = vcombine.high %v1726_v17, %v1733_v18  ;;  %v3700_v35 = vpop.f32.mrb[6].mxu1  ;;  %v3702_v36 = vpop.f32.mrb[7].mxu0 }
 0x1af   : > { %v1279_v37 = vrot.slane %v1272_v23, %v3656_v30  ;;  %v1287_v38 = vrot.slane %v2875_v24, %v3656_v30  ;;  %v1288_v39 = vcombine.low %v1263_v21, %v1271_v22  ;;  %v801_v41 = vrot.slane %v499_v53, %v3656_v30  ;;  %v3707_v42 = vpop.f32.mrb[7].mxu1 }
 0x1b0   : > { %v2223_v44 = vrot.slane %v2216_v33, %v3656_v30  ;;  %v2231_v45 = vrot.slane %v2891_v34, %v3656_v30  ;;  %v2232_v46 = vcombine.low %v2207_v26, %v2215_v31  ;;  %v808_v47 = vrot.slane %v794_v0, %v3656_v30 }
 0x1b1   : > { %v1295_v48 = vrot.slane %v1288_v39, %v3665_v43  ;;  %v1296_v49 = vcombine.low %v1279_v37, %v1287_v38  ;;  %v688_v50 = vadd.f32 %v687_v54, %v3652_v28  ;;  %v501_v51 = vadd.f32 %v500_v55, %v3654_v29  ;;  %v3715_v52 = vpop.f32.mrb[8].mxu0 }
 0x1b2   : > { %v2239_v53 = vrot.slane %v2232_v46, %v3665_v43  ;;  %v2240_v56 = vcombine.low %v2223_v44, %v2231_v45  ;;  %v690_v57 = vadd.f32 %v689_v60, %v3658_v32  ;;  %v505_v58 = vadd.f32 %v504_v5, %v3650_v27  ;;  %v3720_v59 = vpop.f32.mrb[8].mxu1  ;;  %v3722_v61 = vpop.f32.mrb[9].mxu0 }
 0x1b3   : > { %v1303_v62 = vrot.slane %v1296_v49, %v3665_v43  ;;  %v1738_v63 = vcombine.high %v688_v50, %v3351_v40  ;;  %v1745_v54 = vrot.slane %v688_v50, %v3656_v30  ;;  %v809_v55 = vcombine.high %v501_v51, %v3351_v40  ;;  %v3728_v0 = vpop.f32.mrb[9].mxu1 }
 0x1b4   : > { %v2247_v1 = vrot.slane %v2240_v56, %v3665_v43  ;;  %v816_v60 = vrot.slane %v501_v51, %v3656_v30  ;;  %v1753_v2 = vcombine.high %v690_v57, %v3351_v40  ;;  %v1760_v3 = vrot.slane %v690_v57, %v3656_v30 }
 0x1b5   : > { %v1304_v4 = vcombine.low %v1295_v48, %v1303_v62  ;;  %v1305_v5 = vcombine.high %v1295_v48, %v1303_v62  ;;  %v1752_v6 = vrot.slane %v1738_v63, %v3656_v30  ;;  %v823_v7 = vrot.slane %v809_v55, %v3656_v30  ;;  %v3736_v8 = vpop.f32.mrb[10].mxu0 }
 0x1b6   : > { %v2248_v9 = vcombine.low %v2239_v53, %v2247_v1  ;;  %v2249_v12 = vcombine.high %v2239_v53, %v2247_v1  ;;  %v824_v13 = vcombine.low %v801_v41, %v816_v60  ;;  %v825_v14 = vcombine.high %v801_v41, %v816_v60  ;;  %v3738_v15 = vpop.f32.mrb[10].mxu1  ;;  %v3740_v17 = vpop.f32.mrb[11].mxu0 }
 0x1b7   : > { %1656 = vst [vmem:[%s3743_s8] sm:$0xff] %v1304_v4  ;;  %1664 = vst [vmem:[%s3743_s8 + $0x40] sm:$0xff] %v1305_v5  ;;  %v840_v18 = vcombine.low %v808_v47, %v823_v7  ;;  %v841_v19 = vcombine.high %v808_v47, %v823_v7  ;;  %v1767_v20 = vrot.slane %v1753_v2, %v3656_v30  ;;  %v3748_v22 = vpop.f32.mrb[11].mxu1 }
 0x1b8   : > { %v1768_v21 = vcombine.low %v1745_v54, %v1760_v3  ;;  %2600 = vst [vmem:[%s3751_s17] sm:$0xff] %v2248_v9  ;;  %2608 = vst [vmem:[%s3751_s17 + $0x40] sm:$0xff] %v2249_v12  ;;  %v832_v23 = vrot.slane %v824_v13, %v3665_v43  ;;  %v839_v24 = vrot.slane %v825_v14, %v3665_v43 }
 0x1b9   : > { %v1769_v26 = vcombine.high %v1745_v54, %v1760_v3  ;;  %v860_v31 = vcombine.high %v505_v58, %v3351_v40  ;;  %v848_v33 = vrot.slane %v840_v18, %v3665_v43  ;;  %v855_v34 = vrot.slane %v841_v19, %v3665_v43  ;;  %v3761_v39 = vpop.f32.mrb[12].mxu0 }
 0x1ba   : > { %v1776_v37 = vrot.slane %v1768_v21, %v3665_v43  ;;  %v1784_v38 = vcombine.low %v1752_v6, %v1767_v20  ;;  %v1306_v41 = vcombine.low %v832_v23, %v839_v24  ;;  %v2876_v44 = vcombine.high %v832_v23, %v839_v24  ;;  %v3764_v47 = vpop.f32.mrb[12].mxu1  ;;  %v3766_v48 = vpop.f32.mrb[13].mxu0 }
 0x1bb   : > { %v1783_v45 = vrot.slane %v1769_v26, %v3665_v43  ;;  %v1785_v46 = vcombine.high %v1752_v6, %v1767_v20  ;;  %v1322_v49 = vcombine.low %v848_v33, %v855_v34  ;;  %v2877_v50 = vcombine.high %v848_v33, %v855_v34  ;;  %v3770_v56 = vpop.f32.mrb[13].mxu1 }
 0x1bc   : > { %v1792_v51 = vrot.slane %v1784_v38, %v3665_v43  ;;  %v867_v53 = vrot.slane %v505_v58, %v3656_v30  ;;  %v1313_v57 = vrot.slane %v1306_v41, %v3656_v30  ;;  %v1321_v62 = vrot.slane %v2876_v44, %v3656_v30 }
 0x1bd   : > { %v1799_v63 = vrot.slane %v1785_v46, %v3665_v43  ;;  %v2250_v54 = vcombine.low %v1776_v37, %v1783_v45  ;;  %v1329_v55 = vrot.slane %v1322_v49, %v3656_v30  ;;  %v1337_v1 = vrot.slane %v2877_v50, %v3656_v30  ;;  %v3778_v3 = vpop.f32.mrb[14].mxu0 }
 0x1be   : > { %v2892_v60 = vcombine.high %v1776_v37, %v1783_v45  ;;  %v874_v2 = vrot.slane %v860_v31, %v3656_v30  ;;  %v1338_v4 = vcombine.low %v1313_v57, %v1321_v62  ;;  %v3781_v7 = vpop.f32.mrb[14].mxu1  ;;  %v3783_v9 = vpop.f32.mrb[15].mxu0  ;;  %v694_v14 = vadd.f32 %v3684_v10, %v3652_v28 }
 0x1bf   : > { %v2257_v58 = vrot.slane %v2250_v54, %v3656_v30  ;;  %v2266_v5 = vcombine.low %v1792_v51, %v1799_v63  ;;  %v2893_v6 = vcombine.high %v1792_v51, %v1799_v63  ;;  %v1346_v12 = vcombine.low %v1329_v55, %v1337_v1  ;;  %v3790_v19 = vpop.f32.mrb[15].mxu1 }
 0x1c0   : > { %v2265_v13 = vrot.slane %v2892_v60, %v3656_v30  ;;  %v507_v18 = vadd.f32 %v3686_v11, %v3654_v29  ;;  %v1345_v20 = vrot.slane %v1338_v4, %v3665_v43  ;;  %v696_v24 = vadd.f32 %v3690_v16, %v3658_v32 }
 0x1c1   : > { %v2273_v21 = vrot.slane %v2266_v5, %v3656_v30  ;;  %v2281_v23 = vrot.slane %v2893_v6, %v3656_v30  ;;  %v1353_v26 = vrot.slane %v1346_v12, %v3665_v43  ;;  %v1804_v10 = vcombine.high %v694_v14, %v3351_v40 }
 0x1c2   : > { %v2282_v31 = vcombine.low %v2257_v58, %v2265_v13  ;;  %v1811_v11 = vrot.slane %v694_v14, %v3656_v30  ;;  %v875_v34 = vcombine.high %v507_v18, %v3351_v40  ;;  %v882_v37 = vrot.slane %v507_v18, %v3656_v30 }
 0x1c3   : > { %v2290_v33 = vcombine.low %v2273_v21, %v2281_v23  ;;  %v1819_v38 = vcombine.high %v696_v24, %v3351_v40  ;;  %v1354_v41 = vcombine.low %v1345_v20, %v1353_v26  ;;  %v1355_v44 = vcombine.high %v1345_v20, %v1353_v26 }
 0x1c4   : > { %v2289_v16 = vrot.slane %v2282_v31, %v3665_v43  ;;  %v1818_v45 = vrot.slane %v1804_v10, %v3656_v30  ;;  %v889_v49 = vrot.slane %v875_v34, %v3656_v30  ;;  %v890_v50 = vcombine.low %v867_v53, %v882_v37 }
 0x1c5   : > { %v2297_v46 = vrot.slane %v2290_v33, %v3665_v43  ;;  %v891_v51 = vcombine.high %v867_v53, %v882_v37  ;;  %1657 = vst [vmem:[%s3743_s8 + $0x8] sm:$0xff] %v1354_v41  ;;  %1665 = vst [vmem:[%s3743_s8 + $0x48] sm:$0xff] %v1355_v44  ;;  %v1826_v57 = vrot.slane %v696_v24, %v3656_v30 }
 0x1c6   : > { %v1833_v62 = vrot.slane %v1819_v38, %v3656_v30  ;;  %v511_v63 = vadd.f32 %v3696_v25, %v3650_v27  ;;  %v700_v54 = vadd.f32 %v3700_v35, %v3652_v28  ;;  %v898_v60 = vrot.slane %v890_v50, %v3665_v43 }
 0x1c7   : > { %v2298_v55 = vcombine.low %v2289_v16, %v2297_v46  ;;  %v2299_v1 = vcombine.high %v2289_v16, %v2297_v46  ;;  %v905_v4 = vrot.slane %v891_v51, %v3665_v43  ;;  %v906_v53 = vcombine.low %v874_v2, %v889_v49 }
 0x1c8   : > { %v907_v58 = vcombine.high %v874_v2, %v889_v49  ;;  %v1834_v5 = vcombine.low %v1811_v11, %v1826_v57  ;;  %v1835_v6 = vcombine.high %v1811_v11, %v1826_v57  ;;  %v1850_v14 = vcombine.low %v1818_v45, %v1833_v62 }
 0x1c9   : > { %2601 = vst [vmem:[%s3751_s17 + $0x8] sm:$0xff] %v2298_v55  ;;  %2609 = vst [vmem:[%s3751_s17 + $0x48] sm:$0xff] %v2299_v1  ;;  %v1356_v12 = vcombine.low %v898_v60, %v905_v4  ;;  %v2878_v13 = vcombine.high %v898_v60, %v905_v4  ;;  %v1851_v18 = vcombine.high %v1818_v45, %v1833_v62 }
 0x1ca   : > { %v914_v25 = vrot.slane %v906_v53, %v3665_v43  ;;  %v921_v35 = vrot.slane %v907_v58, %v3665_v43  ;;  %v1842_v20 = vrot.slane %v1834_v5, %v3665_v43  ;;  %v1849_v21 = vrot.slane %v1835_v6, %v3665_v43 }
 0x1cb   : > { %v1363_v23 = vrot.slane %v1356_v12, %v3656_v30  ;;  %v1371_v2 = vrot.slane %v2878_v13, %v3656_v30  ;;  %v1858_v24 = vrot.slane %v1850_v14, %v3665_v43  ;;  %v1865_v26 = vrot.slane %v1851_v18, %v3665_v43 }
 0x1cc   : > { %v1372_v31 = vcombine.low %v914_v25, %v921_v35  ;;  %v2879_v10 = vcombine.high %v914_v25, %v921_v35  ;;  %v2300_v11 = vcombine.low %v1842_v20, %v1849_v21  ;;  %v2894_v33 = vcombine.high %v1842_v20, %v1849_v21 }
 0x1cd   : > { %v1388_v34 = vcombine.low %v1363_v23, %v1371_v2  ;;  %v2316_v37 = vcombine.low %v1858_v24, %v1865_v26  ;;  %v2895_v38 = vcombine.high %v1858_v24, %v1865_v26  ;;  %v926_v41 = vcombine.high %v511_v63, %v3351_v40 }
 0x1ce   : > { %v1379_v44 = vrot.slane %v1372_v31, %v3656_v30  ;;  %v1387_v16 = vrot.slane %v2879_v10, %v3656_v30  ;;  %v2307_v45 = vrot.slane %v2300_v11, %v3656_v30  ;;  %v2315_v46 = vrot.slane %v2894_v33, %v3656_v30 }
 0x1cf   : > { %v1395_v49 = vrot.slane %v1388_v34, %v3665_v43  ;;  %v2323_v50 = vrot.slane %v2316_v37, %v3656_v30  ;;  %v2331_v51 = vrot.slane %v2895_v38, %v3656_v30  ;;  %v933_v57 = vrot.slane %v511_v63, %v3656_v30 }
 0x1d0   : > { %v1396_v62 = vcombine.low %v1379_v44, %v1387_v16  ;;  %v2332_v55 = vcombine.low %v2307_v45, %v2315_v46  ;;  %v940_v1 = vrot.slane %v926_v41, %v3656_v30  ;;  %v1870_v60 = vcombine.high %v700_v54, %v3351_v40 }
 0x1d1   : > { %v2340_v4 = vcombine.low %v2323_v50, %v2331_v51  ;;  %v1877_v53 = vrot.slane %v700_v54, %v3656_v30  ;;  %v513_v58 = vadd.f32 %v3702_v36, %v3654_v29  ;;  %v702_v5 = vadd.f32 %v3707_v42, %v3658_v32 }
 0x1d2   : > { %v1403_v6 = vrot.slane %v1396_v62, %v3665_v43  ;;  %v2339_v63 = vrot.slane %v2332_v55, %v3665_v43  ;;  %v1884_v12 = vrot.slane %v1870_v60, %v3656_v30  ;;  %v517_v13 = vadd.f32 %v3715_v52, %v3650_v27 }
 0x1d3   : > { %v2347_v14 = vrot.slane %v2340_v4, %v3665_v43  ;;  %v941_v54 = vcombine.high %v513_v58, %v3351_v40  ;;  %v948_v36 = vrot.slane %v513_v58, %v3656_v30  ;;  %v1885_v42 = vcombine.high %v702_v5, %v3351_v40 }
 0x1d4   : > { %v1404_v18 = vcombine.low %v1395_v49, %v1403_v6  ;;  %v1405_v25 = vcombine.high %v1395_v49, %v1403_v6  ;;  %v1892_v35 = vrot.slane %v702_v5, %v3656_v30  ;;  %v992_v20 = vcombine.high %v517_v13, %v3351_v40 }
 0x1d5   : > { %v2348_v21 = vcombine.low %v2339_v63, %v2347_v14  ;;  %v2349_v23 = vcombine.high %v2339_v63, %v2347_v14  ;;  %v955_v52 = vrot.slane %v941_v54, %v3656_v30  ;;  %v956_v2 = vcombine.low %v933_v57, %v948_v36 }
 0x1d6   : > { %1658 = vst [vmem:[%s3743_s8 + $0x10] sm:$0xff] %v1404_v18  ;;  %1666 = vst [vmem:[%s3743_s8 + $0x50] sm:$0xff] %v1405_v25  ;;  %v957_v24 = vcombine.high %v933_v57, %v948_v36  ;;  %v1899_v26 = vrot.slane %v1885_v42, %v3656_v30  ;;  %v1900_v31 = vcombine.low %v1877_v53, %v1892_v35 }
 0x1d7   : > { %v1901_v10 = vcombine.high %v1877_v53, %v1892_v35  ;;  %2602 = vst [vmem:[%s3751_s17 + $0x10] sm:$0xff] %v2348_v21  ;;  %2610 = vst [vmem:[%s3751_s17 + $0x50] sm:$0xff] %v2349_v23  ;;  %v964_v11 = vrot.slane %v956_v2, %v3665_v43  ;;  %v972_v33 = vcombine.low %v940_v1, %v955_v52 }
 0x1d8   : > { %v973_v34 = vcombine.high %v940_v1, %v955_v52  ;;  %v999_v37 = vrot.slane %v517_v13, %v3656_v30  ;;  %v971_v38 = vrot.slane %v957_v24, %v3665_v43  ;;  %v1908_v41 = vrot.slane %v1900_v31, %v3665_v43 }
 0x1d9   : > { %v1915_v44 = vrot.slane %v1901_v10, %v3665_v43  ;;  %v1916_v16 = vcombine.low %v1884_v12, %v1899_v26  ;;  %v980_v45 = vrot.slane %v972_v33, %v3665_v43  ;;  %v1917_v49 = vcombine.high %v1884_v12, %v1899_v26 }
 0x1da   : > { %v987_v46 = vrot.slane %v973_v34, %v3665_v43  ;;  %v1006_v50 = vrot.slane %v992_v20, %v3656_v30  ;;  %v1406_v51 = vcombine.low %v964_v11, %v971_v38  ;;  %v2880_v57 = vcombine.high %v964_v11, %v971_v38 }
 0x1db   : > { %v1924_v62 = vrot.slane %v1916_v16, %v3665_v43  ;;  %v2350_v55 = vcombine.low %v1908_v41, %v1915_v44  ;;  %v1931_v4 = vrot.slane %v1917_v49, %v3665_v43  ;;  %v2896_v53 = vcombine.high %v1908_v41, %v1915_v44 }
 0x1dc   : > { %v1422_v1 = vcombine.low %v980_v45, %v987_v46  ;;  %v2881_v60 = vcombine.high %v980_v45, %v987_v46  ;;  %v1413_v58 = vrot.slane %v1406_v51, %v3656_v30  ;;  %v1421_v5 = vrot.slane %v2880_v57, %v3656_v30 }
 0x1dd   : > { %v2357_v6 = vrot.slane %v2350_v55, %v3656_v30  ;;  %v706_v63 = vadd.f32 %v3720_v59, %v3652_v28  ;;  %v2365_v14 = vrot.slane %v2896_v53, %v3656_v30  ;;  %v2366_v54 = vcombine.low %v1924_v62, %v1931_v4 }
 0x1de   : > { %v1429_v12 = vrot.slane %v1422_v1, %v3656_v30  ;;  %v1437_v13 = vrot.slane %v2881_v60, %v3656_v30  ;;  %v1438_v36 = vcombine.low %v1413_v58, %v1421_v5  ;;  %v2897_v42 = vcombine.high %v1924_v62, %v1931_v4 }
 0x1df   : > { %v1936_v18 = vcombine.high %v706_v63, %v3351_v40  ;;  %v1943_v25 = vrot.slane %v706_v63, %v3656_v30  ;;  %v2373_v20 = vrot.slane %v2366_v54, %v3656_v30  ;;  %v2382_v21 = vcombine.low %v2357_v6, %v2365_v14 }
 0x1e0   : > { %v1446_v35 = vcombine.low %v1429_v12, %v1437_v13  ;;  %v519_v59 = vadd.f32 %v3722_v61, %v3654_v29  ;;  %v1445_v23 = vrot.slane %v1438_v36, %v3665_v43  ;;  %v2381_v52 = vrot.slane %v2897_v42, %v3656_v30 }
 0x1e1   : > { %v1950_v2 = vrot.slane %v1936_v18, %v3656_v30  ;;  %v708_v24 = vadd.f32 %v3728_v0, %v3658_v32  ;;  %v2389_v31 = vrot.slane %v2382_v21, %v3665_v43  ;;  %v523_v38 = vadd.f32 %v3736_v8, %v3650_v27 }
 0x1e2   : > { %v1453_v26 = vrot.slane %v1446_v35, %v3665_v43  ;;  %v1007_v10 = vcombine.high %v519_v59, %v3351_v40  ;;  %v1014_v11 = vrot.slane %v519_v59, %v3656_v30  ;;  %v2390_v61 = vcombine.low %v2373_v20, %v2381_v52 }
 0x1e3   : > { %v1951_v33 = vcombine.high %v708_v24, %v3351_v40  ;;  %v1958_v34 = vrot.slane %v708_v24, %v3656_v30  ;;  %v1065_v52 = vrot.slane %v523_v38, %v3656_v30 }
 0x1e4   : > { %v1454_v41 = vcombine.low %v1445_v23, %v1453_v26  ;;  %v1455_v0 = vcombine.high %v1445_v23, %v1453_v26  ;;  %v1021_v44 = vrot.slane %v1007_v10, %v3656_v30  ;;  %v1022_v16 = vcombine.low %v999_v37, %v1014_v11 }
 0x1e5   : > { %v2397_v45 = vrot.slane %v2390_v61, %v3665_v43  ;;  %v1023_v46 = vcombine.high %v999_v37, %v1014_v11  ;;  %v1965_v49 = vrot.slane %v1951_v33, %v3656_v30  ;;  %v1966_v51 = vcombine.low %v1943_v25, %v1958_v34 }
 0x1e6   : > { %1659 = vst [vmem:[%s3743_s8 + $0x18] sm:$0xff] %v1454_v41  ;;  %1667 = vst [vmem:[%s3743_s8 + $0x58] sm:$0xff] %v1455_v0  ;;  %v1030_v57 = vrot.slane %v1022_v16, %v3665_v43  ;;  %v1038_v62 = vcombine.low %v1006_v50, %v1021_v44  ;;  %v1039_v55 = vcombine.high %v1006_v50, %v1021_v44 }
 0x1e7   : > { %v1967_v8 = vcombine.high %v1943_v25, %v1958_v34  ;;  %v2398_v1 = vcombine.low %v2389_v31, %v2397_v45  ;;  %v2399_v60 = vcombine.high %v2389_v31, %v2397_v45  ;;  %v1037_v4 = vrot.slane %v1023_v46, %v3665_v43 }
 0x1e8   : > { %v1974_v53 = vrot.slane %v1966_v51, %v3665_v43  ;;  %v1046_v37 = vrot.slane %v1038_v62, %v3665_v43  ;;  %v1053_v58 = vrot.slane %v1039_v55, %v3665_v43  ;;  %v1982_v6 = vcombine.low %v1950_v2, %v1965_v49 }
 0x1e9   : > { %v1981_v5 = vrot.slane %v1967_v8, %v3665_v43  ;;  %2603 = vst [vmem:[%s3751_s17 + $0x18] sm:$0xff] %v2398_v1  ;;  %2611 = vst [vmem:[%s3751_s17 + $0x58] sm:$0xff] %v2399_v60  ;;  %v1456_v63 = vcombine.low %v1030_v57, %v1037_v4  ;;  %v2882_v12 = vcombine.high %v1030_v57, %v1037_v4 }
 0x1ea   : > { %v1983_v13 = vcombine.high %v1950_v2, %v1965_v49  ;;  %v1058_v50 = vcombine.high %v523_v38, %v3351_v40  ;;  %v1472_v14 = vcombine.low %v1046_v37, %v1053_v58  ;;  %v2883_v54 = vcombine.high %v1046_v37, %v1053_v58 }
 0x1eb   : > { %v1990_v36 = vrot.slane %v1982_v6, %v3665_v43  ;;  %v2400_v42 = vcombine.low %v1974_v53, %v1981_v5  ;;  %v1463_v18 = vrot.slane %v1456_v63, %v3656_v30  ;;  %v1471_v25 = vrot.slane %v2882_v12, %v3656_v30 }
 0x1ec   : > { %v1997_v35 = vrot.slane %v1983_v13, %v3665_v43  ;;  %v2898_v20 = vcombine.high %v1974_v53, %v1981_v5  ;;  %v1479_v21 = vrot.slane %v1472_v14, %v3656_v30  ;;  %v1487_v59 = vrot.slane %v2883_v54, %v3656_v30 }
 0x1ed   : > { %v2407_v23 = vrot.slane %v2400_v42, %v3656_v30  ;;  %v1488_v2 = vcombine.low %v1463_v18, %v1471_v25  ;;  %v1072_v11 = vrot.slane %v1058_v50, %v3656_v30  ;;  %v712_v61 = vadd.f32 %v3738_v15, %v3652_v28 }
 0x1ee   : > { %v2415_v24 = vrot.slane %v2898_v20, %v3656_v30  ;;  %v2416_v26 = vcombine.low %v1990_v36, %v1997_v35  ;;  %v2899_v31 = vcombine.high %v1990_v36, %v1997_v35  ;;  %v1496_v10 = vcombine.low %v1479_v21, %v1487_v59 }
 0x1ef   : > { %v525_v33 = vadd.f32 %v3740_v17, %v3654_v29  ;;  %v1495_v34 = vrot.slane %v1488_v2, %v3665_v43  ;;  %v2002_v16 = vcombine.high %v712_v61, %v3351_v40  ;;  %v2009_v45 = vrot.slane %v712_v61, %v3656_v30 }
 0x1f0   : > { %v2423_v41 = vrot.slane %v2416_v26, %v3656_v30  ;;  %v2431_v38 = vrot.slane %v2899_v31, %v3656_v30  ;;  %v2432_v0 = vcombine.low %v2407_v23, %v2415_v24  ;;  %v1503_v44 = vrot.slane %v1496_v10, %v3665_v43 }
 0x1f1   : > { %v1073_v15 = vcombine.high %v525_v33, %v3351_v40  ;;  %v1080_v49 = vrot.slane %v525_v33, %v3656_v30  ;;  %v714_v51 = vadd.f32 %v3748_v22, %v3658_v32  ;;  %v2016_v55 = vrot.slane %v2002_v16, %v3656_v30 }
 0x1f2   : > { %v2439_v46 = vrot.slane %v2432_v0, %v3665_v43  ;;  %v2440_v17 = vcombine.low %v2423_v41, %v2431_v38  ;;  %v1504_v57 = vcombine.low %v1495_v34, %v1503_v44  ;;  %v1505_v62 = vcombine.high %v1495_v34, %v1503_v44 }
 0x1f3   : > { %v1087_v8 = vrot.slane %v1073_v15, %v3656_v30  ;;  %v1088_v60 = vcombine.low %v1065_v52, %v1080_v49  ;;  %v1089_v4 = vcombine.high %v1065_v52, %v1080_v49  ;;  %v2017_v53 = vcombine.high %v714_v51, %v3351_v40 }
 0x1f4   : > { %v2447_v1 = vrot.slane %v2440_v17, %v3665_v43  ;;  %1660 = vst [vmem:[%s3743_s8 + $0x20] sm:$0xff] %v1504_v57  ;;  %1668 = vst [vmem:[%s3743_s8 + $0x60] sm:$0xff] %v1505_v62  ;;  %v2024_v22 = vrot.slane %v714_v51, %v3656_v30  ;;  %v529_v5 = vadd.f32 %v3761_v39, %v3650_v27 }
 0x1f5   : > { %v1104_v37 = vcombine.low %v1072_v11, %v1087_v8  ;;  %v1105_v58 = vcombine.high %v1072_v11, %v1087_v8  ;;  %v1096_v12 = vrot.slane %v1088_v60, %v3665_v43  ;;  %v1103_v13 = vrot.slane %v1089_v4, %v3665_v43 }
 0x1f6   : > { %v2448_v6 = vcombine.low %v2439_v46, %v2447_v1  ;;  %v2449_v63 = vcombine.high %v2439_v46, %v2447_v1  ;;  %v2031_v54 = vrot.slane %v2017_v53, %v3656_v30  ;;  %v2032_v36 = vcombine.low %v2009_v45, %v2024_v22 }
 0x1f7   : > { %v1112_v50 = vrot.slane %v1104_v37, %v3665_v43  ;;  %v1119_v14 = vrot.slane %v1105_v58, %v3665_v43  ;;  %v1506_v42 = vcombine.low %v1096_v12, %v1103_v13  ;;  %v2884_v18 = vcombine.high %v1096_v12, %v1103_v13 }
 0x1f8   : > { %2604 = vst [vmem:[%s3751_s17 + $0x20] sm:$0xff] %v2448_v6  ;;  %2612 = vst [vmem:[%s3751_s17 + $0x60] sm:$0xff] %v2449_v63  ;;  %v2033_v25 = vcombine.high %v2009_v45, %v2024_v22  ;;  %v1124_v39 = vcombine.high %v529_v5, %v3351_v40  ;;  %v2040_v21 = vrot.slane %v2032_v36, %v3665_v43 }
 0x1f9   : > { %v1522_v35 = vcombine.low %v1112_v50, %v1119_v14  ;;  %v2885_v20 = vcombine.high %v1112_v50, %v1119_v14  ;;  %v2048_v59 = vcombine.low %v2016_v55, %v2031_v54  ;;  %v1513_v23 = vrot.slane %v1506_v42, %v3656_v30 }
 0x1fa   : > { %v1521_v52 = vrot.slane %v2884_v18, %v3656_v30  ;;  %v2047_v2 = vrot.slane %v2033_v25, %v3665_v43  ;;  %v2049_v24 = vcombine.high %v2016_v55, %v2031_v54  ;;  %v1131_v11 = vrot.slane %v529_v5, %v3656_v30 }
 0x1fb   : > { %v1529_v26 = vrot.slane %v1522_v35, %v3656_v30  ;;  %v1537_v31 = vrot.slane %v2885_v20, %v3656_v30  ;;  %v2056_v10 = vrot.slane %v2048_v59, %v3665_v43  ;;  %v1138_v0 = vrot.slane %v1124_v39, %v3656_v30 }
 0x1fc   : > { %v1538_v61 = vcombine.low %v1513_v23, %v1521_v52  ;;  %v2063_v33 = vrot.slane %v2049_v24, %v3665_v43  ;;  %v2450_v34 = vcombine.low %v2040_v21, %v2047_v2  ;;  %v2900_v41 = vcombine.high %v2040_v21, %v2047_v2 }
 0x1fd   : > { %v1546_v38 = vcombine.low %v1529_v26, %v1537_v31  ;;  %v718_v44 = vadd.f32 %v3764_v47, %v3652_v28  ;;  %v531_v16 = vadd.f32 %v3766_v48, %v3654_v29  ;;  %v720_v63 = vadd.f32 %v3770_v56, %v3658_v32 }
 0x1fe   : > { %v1545_v45 = vrot.slane %v1538_v61, %v3665_v43  ;;  %v2457_v15 = vrot.slane %v2450_v34, %v3656_v30  ;;  %v2465_v46 = vrot.slane %v2900_v41, %v3656_v30  ;;  %v2466_v17 = vcombine.low %v2056_v10, %v2063_v33 }
 0x1ff   : > { %v1553_v49 = vrot.slane %v1546_v38, %v3665_v43  ;;  %v2901_v51 = vcombine.high %v2056_v10, %v2063_v33  ;;  %v2068_v57 = vcombine.high %v718_v44, %v3351_v40  ;;  %v2075_v62 = vrot.slane %v718_v44, %v3656_v30 }
 0x200   : > { %v2473_v47 = vrot.slane %v2466_v17, %v3656_v30  ;;  %v2482_v55 = vcombine.low %v2457_v15, %v2465_v46  ;;  %v1139_v48 = vcombine.high %v531_v16, %v3351_v40  ;;  %v1146_v8 = vrot.slane %v531_v16, %v3656_v30 }
 0x201   : > { %v1554_v1 = vcombine.low %v1545_v45, %v1553_v49  ;;  %v1555_v60 = vcombine.high %v1545_v45, %v1553_v49  ;;  %v2481_v4 = vrot.slane %v2901_v51, %v3656_v30  ;;  %v2082_v53 = vrot.slane %v2068_v57, %v3656_v30 }
 0x202   : > { %v2489_v37 = vrot.slane %v2482_v55, %v3665_v43  ;;  %v1153_v58 = vrot.slane %v1139_v48, %v3656_v30  ;;  %v1154_v22 = vcombine.low %v1131_v11, %v1146_v8  ;;  %v1155_v5 = vcombine.high %v1131_v11, %v1146_v8 }
 0x203   : > { %1661 = vst [vmem:[%s3743_s8 + $0x28] sm:$0xff] %v1554_v1  ;;  %1669 = vst [vmem:[%s3743_s8 + $0x68] sm:$0xff] %v1555_v60  ;;  %v2490_v6 = vcombine.low %v2473_v47, %v2481_v4  ;;  %v535_v12 = vadd.f32 %v3778_v3, %v3650_v27  ;;  %v724_v13 = vadd.f32 %v3781_v7, %v3652_v28 }
 0x204   : > { %v1162_v50 = vrot.slane %v1154_v22, %v3665_v43  ;;  %v1169_v14 = vrot.slane %v1155_v5, %v3665_v43  ;;  %v1170_v54 = vcombine.low %v1138_v0, %v1153_v58  ;;  %v1171_v36 = vcombine.high %v1138_v0, %v1153_v58 }
 0x205   : > { %v2497_v42 = vrot.slane %v2490_v6, %v3665_v43  ;;  %v2083_v18 = vcombine.high %v720_v63, %v3351_v40  ;;  %v2090_v56 = vrot.slane %v720_v63, %v3656_v30  ;;  %v1190_v25 = vcombine.high %v535_v12, %v3351_v40 }
 0x206   : > { %v1178_v27 = vrot.slane %v1170_v54, %v3665_v43  ;;  %v1185_v28 = vrot.slane %v1171_v36, %v3665_v43  ;;  %v1556_v3 = vcombine.low %v1162_v50, %v1169_v14  ;;  %v2886_v7 = vcombine.high %v1162_v50, %v1169_v14 }
 0x207   : > { %v2498_v39 = vcombine.low %v2489_v37, %v2497_v42  ;;  %v2499_v35 = vcombine.high %v2489_v37, %v2497_v42  ;;  %v2097_v20 = vrot.slane %v2083_v18, %v3656_v30  ;;  %v2098_v21 = vcombine.low %v2075_v62, %v2090_v56 }
 0x208   : > { %v1563_v59 = vrot.slane %v1556_v3, %v3656_v30  ;;  %v1571_v23 = vrot.slane %v2886_v7, %v3656_v30  ;;  %v1572_v52 = vcombine.low %v1178_v27, %v1185_v28  ;;  %v2887_v2 = vcombine.high %v1178_v27, %v1185_v28 }
 0x209   : > { %2605 = vst [vmem:[%s3751_s17 + $0x28] sm:$0xff] %v2498_v39  ;;  %2613 = vst [vmem:[%s3751_s17 + $0x68] sm:$0xff] %v2499_v35  ;;  %v2099_v24 = vcombine.high %v2075_v62, %v2090_v56  ;;  %v2106_v26 = vrot.slane %v2098_v21, %v3665_v43  ;;  %v2114_v31 = vcombine.low %v2082_v53, %v2097_v20 }
 0x20a   : > { %v2115_v10 = vcombine.high %v2082_v53, %v2097_v20  ;;  %v1579_v11 = vrot.slane %v1572_v52, %v3656_v30  ;;  %v1587_v61 = vrot.slane %v2887_v2, %v3656_v30  ;;  %v1588_v33 = vcombine.low %v1563_v59, %v1571_v23 }
 0x20b   : > { %v2113_v34 = vrot.slane %v2099_v24, %v3665_v43  ;;  %v2122_v41 = vrot.slane %v2114_v31, %v3665_v43  ;;  %v1197_v0 = vrot.slane %v535_v12, %v3656_v30  ;;  %v1204_v45 = vrot.slane %v1190_v25, %v3656_v30 }
 0x20c   : > { %v2129_v38 = vrot.slane %v2115_v10, %v3665_v43  ;;  %v1595_v44 = vrot.slane %v1588_v33, %v3665_v43  ;;  %v1596_v16 = vcombine.low %v1579_v11, %v1587_v61  ;;  %v2134_v15 = vcombine.high %v724_v13, %v3351_v40 }
 0x20d   : > { %v2500_v46 = vcombine.low %v2106_v26, %v2113_v34  ;;  %v2902_v17 = vcombine.high %v2106_v26, %v2113_v34  ;;  %v2141_v62 = vrot.slane %v724_v13, %v3656_v30  ;;  %v537_v47 = vadd.f32 %v3783_v9, %v3654_v29 }
 0x20e   : > { %v2516_v49 = vcombine.low %v2122_v41, %v2129_v38  ;;  %v2903_v51 = vcombine.high %v2122_v41, %v2129_v38  ;;  %v1603_v57 = vrot.slane %v1596_v16, %v3665_v43  ;;  %v726_v55 = vadd.f32 %v3790_v19, %v3658_v32 }
 0x20f   : > { %v2507_v48 = vrot.slane %v2500_v46, %v3656_v30  ;;  %v2515_v8 = vrot.slane %v2902_v17, %v3656_v30  ;;  %v1205_v37 = vcombine.high %v537_v47, %v3351_v40  ;;  %v1212_v58 = vrot.slane %v537_v47, %v3656_v30 }
 0x210   : > { %v2523_v1 = vrot.slane %v2516_v49, %v3656_v30  ;;  %v2531_v60 = vrot.slane %v2903_v51, %v3656_v30  ;;  %v1604_v4 = vcombine.low %v1595_v44, %v1603_v57  ;;  %v1605_v53 = vcombine.high %v1595_v44, %v1603_v57 }
 0x211   : > { %v2532_v22 = vcombine.low %v2507_v48, %v2515_v8  ;;  %v2149_v29 = vcombine.high %v726_v55, %v3351_v40  ;;  %v2156_v32 = vrot.slane %v726_v55, %v3656_v30  ;;  %v2148_v9 = vrot.slane %v2134_v15, %v3656_v30 }
 0x212   : > { %v2540_v5 = vcombine.low %v2523_v1, %v2531_v60  ;;  %1662 = vst [vmem:[%s3743_s8 + $0x30] sm:$0xff] %v1604_v4  ;;  %1670 = vst [vmem:[%s3743_s8 + $0x70] sm:$0xff] %v1605_v53  ;;  %v1219_v19 = vrot.slane %v1205_v37, %v3656_v30  ;;  %v1220_v6 = vcombine.low %v1197_v0, %v1212_v58 }
 0x213   : > { %v1221_v63 = vcombine.high %v1197_v0, %v1212_v58  ;;  %v2539_v12 = vrot.slane %v2532_v22, %v3665_v43  ;;  %v2163_v50 = vrot.slane %v2149_v29, %v3656_v30  ;;  %v2164_v14 = vcombine.low %v2141_v62, %v2156_v32 }
 0x214   : > { %v2547_v13 = vrot.slane %v2540_v5, %v3665_v43  ;;  %v1228_v40 = vrot.slane %v1220_v6, %v3665_v43  ;;  %v1236_v36 = vcombine.low %v1204_v45, %v1219_v19  ;;  %v1237_v42 = vcombine.high %v1204_v45, %v1219_v19 }
 0x215   : > { %v1235_v54 = vrot.slane %v1221_v63, %v3665_v43  ;;  %v2165_v25 = vcombine.high %v2141_v62, %v2156_v32  ;;  %v2172_v27 = vrot.slane %v2164_v14, %v3665_v43  ;;  %v2180_v20 = vcombine.low %v2148_v9, %v2163_v50 }
 0x216   : > { %v2548_v18 = vcombine.low %v2539_v12, %v2547_v13  ;;  %v2549_v56 = vcombine.high %v2539_v12, %v2547_v13  ;;  %v1244_v28 = vrot.slane %v1236_v36, %v3665_v43  ;;  %v1251_v3 = vrot.slane %v1237_v42, %v3665_v43 }
 0x217   : > { %v1606_v7 = vcombine.low %v1228_v40, %v1235_v54  ;;  %v2888_v39 = vcombine.high %v1228_v40, %v1235_v54  ;;  %v2179_v35 = vrot.slane %v2165_v25, %v3665_v43  ;;  %v2181_v21 = vcombine.high %v2148_v9, %v2163_v50 }
 0x218   : > { %2606 = vst [vmem:[%s3751_s17 + $0x30] sm:$0xff] %v2548_v18  ;;  %2614 = vst [vmem:[%s3751_s17 + $0x70] sm:$0xff] %v2549_v56  ;;  %v1622_v52 = vcombine.low %v1244_v28, %v1251_v3  ;;  %v2889_v2 = vcombine.high %v1244_v28, %v1251_v3  ;;  %v2188_v24 = vrot.slane %v2180_v20, %v3665_v43 }
 0x219   : > { %v1613_v59 = vrot.slane %v1606_v7, %v3656_v30  ;;  %v1621_v23 = vrot.slane %v2888_v39, %v3656_v30  ;;  %v2195_v26 = vrot.slane %v2181_v21, %v3665_v43  ;;  %v2550_v31 = vcombine.low %v2172_v27, %v2179_v35 }
 0x21a   : > { %v2904_v10 = vcombine.high %v2172_v27, %v2179_v35  ;;  %v1629_v11 = vrot.slane %v1622_v52, %v3656_v30  ;;  %v1637_v61 = vrot.slane %v2889_v2, %v3656_v30 }
 0x21b   : > { %v1638_v33 = vcombine.low %v1613_v59, %v1621_v23  ;;  %v2557_v34 = vrot.slane %v2550_v31, %v3656_v30  ;;  %v2566_v38 = vcombine.low %v2188_v24, %v2195_v26  ;;  %v2905_v0 = vcombine.high %v2188_v24, %v2195_v26 }
 0x21c   : > { %v2565_v41 = vrot.slane %v2904_v10, %v3656_v30  ;;  %v1646_v44 = vcombine.low %v1629_v11, %v1637_v61 }
 0x21d   : > { %v2573_v16 = vrot.slane %v2566_v38, %v3656_v30  ;;  %v2581_v45 = vrot.slane %v2905_v0, %v3656_v30  ;;  %v1645_v46 = vrot.slane %v1638_v33, %v3665_v43 }
 0x21e   : > { %v2582_v15 = vcombine.low %v2557_v34, %v2565_v41  ;;  %v1653_v17 = vrot.slane %v1646_v44, %v3665_v43 }
 0x21f   : > { %v2590_v49 = vcombine.low %v2573_v16, %v2581_v45 }
 0x220   : > { %v1654_v51 = vcombine.low %v1645_v46, %v1653_v17  ;;  %v1655_v57 = vcombine.high %v1645_v46, %v1653_v17  ;;  %v2589_v62 = vrot.slane %v2582_v15, %v3665_v43 }
 0x221   : > { %v2597_v47 = vrot.slane %v2590_v49, %v3665_v43 }
 0x222   : > { %1663 = vst [vmem:[%s3743_s8 + $0x38] sm:$0xff] %v1654_v51  ;;  %1671 = vst [vmem:[%s3743_s8 + $0x78] sm:$0xff] %v1655_v57 }
 0x223   : > { %v2598_v55 = vcombine.low %v2589_v62, %v2597_v47  ;;  %v2599_v48 = vcombine.high %v2589_v62, %v2597_v47 }
 0x225   : > { %2607 = vst [vmem:[%s3751_s17 + $0x38] sm:$0xff] %v2598_v55  ;;  %2615 = vst [vmem:[%s3751_s17 + $0x78] sm:$0xff] %v2599_v48 }
 0x226   : > { %s2908_s30 = sshll.u32 %s3326_s24, 3  ;;  %s2909_s12 = sshll.u32 %s3330_s25, 5 }
 0x227   : > { %s2634_s15 = sadd.s32 %s2909_s12, %s2908_s30  ;;  %s2653_s13 = sshll.u32 %s3743_s8, 4  ;;  %s2654_s13 = int_to_ptr.vmem [resolvable:$true] %s2653_s13 }
 0x228   : > { %s2910_s6 = sshll.u32 %s2634_s15, 7  ;;  %s4171_s20 = sld [smem:[#allocation25_spill]] }
 0x229   : > { %s3352_s7 = smov 1024   ;;  %s3353_s9 = smov 2048  }
 0x22a   : > { %3055 = sst [smem:[#allocation12]] (%p3547_p8), %s3352_s7  ;;  %s3354_s11 = smov 8  }
 0x22b   : > { %3056 = sst [smem:[#allocation12 + $0x1]] (%p3547_p8), %s3353_s9  ;;  %s3355_s24 = smov 128  }
 0x22c   : > { %3057 = sst [smem:[#allocation12 + $0x2]] (%p3547_p8), %s3354_s11  ;;  %s3356_s25 = smov [#allocation11]  }
 0x22d   : > { %3058 = sst [smem:[#allocation12 + $0x3]] (%p3547_p8), %s3355_s24  ;;  %s3357_s16 = smov 0  }
 0x22e   : > { %s2636_s5 = scalar_lea.hbm %s4171_s20, %s2910_s6  ;;  %3059 = sst [smem:[#allocation12 + $0x4]] (%p3547_p8), %s3355_s24 }
 0x22f   : > { %3060 = sst [smem:[#allocation12 + $0x5]] (%p3547_p8), %s3354_s11 }
 0x230   : > { %3061 = dma.general (%p3547_p8), %s2654_s13, 2048, %s2636_s5, %s2617_s10, %s3356_s25, [#allocation12], %s3357_s16, 0  }
 0x231   : > { %s4172_s12 = sld [smem:[#allocation26_spill]]  ;;  %s2700_s21 = sshll.u32 %s3751_s17, 4  ;;  %s2701_s21 = int_to_ptr.vmem [resolvable:$true] %s2700_s21 }
 0x232   : > { %s3358_s3 = smov 1024   ;;  %s3359_s20 = smov 2048  }
 0x233   : > { %3062 = sst [smem:[#allocation14]] (%p3547_p8), %s3358_s3  ;;  %s3360_s10 = smov 8  }
 0x234   : > { %3063 = sst [smem:[#allocation14 + $0x1]] (%p3547_p8), %s3359_s20  ;;  %s3361_s13 = smov 128  }
 0x235   : > { %3064 = sst [smem:[#allocation14 + $0x2]] (%p3547_p8), %s3360_s10  ;;  %s3362_s5 = smov [#allocation13]  }
 0x236   : > { %3065 = sst [smem:[#allocation14 + $0x3]] (%p3547_p8), %s3361_s13 }
 0x237   : > { %s2683_s15 = scalar_lea.hbm %s4172_s12, %s2910_s6  ;;  %3066 = sst [smem:[#allocation14 + $0x4]] (%p3547_p8), %s3361_s13 }
 0x238   : > { %3067 = sst [smem:[#allocation14 + $0x5]] (%p3547_p8), %s3360_s10  ;;  %s3363_s6 = smov 0  }
 0x239   : > { %3068 = dma.general (%p3547_p8), %s2701_s21, 2048, %s2683_s15, %s2622_s19, %s3362_s5, [#allocation14], %s3363_s6, 0  }
 0x23a PF: > { %s4173_s17 = sld [smem:[#allocation19_spill]]  ;;  %s4174_s7 = sld [smem:[#allocation20_spill]] }
 0x23b   : > { %p3094_p4 = scmp.ge.s32.totalorder %s3342_s28, 2 }
 0x240   : > { %s2728_s9 = sand.u32 1, %s4173_s17   ;;  %p4175_p10 = scmp.ne.s32.totalorder %s4174_s7, 0 }
 0x241   : > { %s2729_s11 = scalar_lea.sflag [#allocation4], %s2728_s9 }
 0x242   : > { %p3083_p6 = pnand %p3094_p4, %p4175_p10 }
 0x244   : > { %3305 = dma.done.wait (!%p3083_p6), %s2729_s11, 2048  }
 0x245   : > { %3307 = vsyncadd (!%p3083_p6), %s2729_s11, 4294965248  ;;  %s2738_s24 = scalar_lea.sflag [#allocation10], %s2728_s9 }
 0x246   : > { %3309 = dma.done.wait (!%p3083_p6), %s2738_s24, 2048  }
 0x247   : > { %3311 = vsyncadd (!%p3083_p6), %s2738_s24, 4294965248  ;;  %s27_s28 = sadd.s32 1, %s3342_s28   ;;  %s4176_s18 = sld [smem:[#allocation21_spill]] }
 0x248   : > { %p24_p11 = scmp.ge.s32.totalorder %s27_s28, 6   ;;  %s4177_s21 = smov %s3318_s22 }
 0x249   : > { %s4178_s22 = smov %s3322_s23  ;;  %s4179_s23 = smov %s3560_s1 }
 0x24a   : > { %s4180_s24 = smov %s3334_s26  ;;  %s4181_s25 = smov %s3338_s27 }
 0x24b   : > { %s4183_s27 = smov %s4189_s14  ;;  %26 = sbr.rel (!%p24_p11) target bundleno = 15 (0xf), region = 120 }
 0x24d   : > { %s4182_s26 = smov %s4176_s18 }
 0x252   :  { %2743 = vsyncpa [#allocation3], 1 }
 0x253   :  { %2745 = vsyncpa [#allocation3 + $0x1], 1 }
 0x254   :  { %2746 = vsyncpa [#allocation6], 1 }
 0x255   :  { %2747 = vsyncpa [#allocation4], 1 }
 0x256   :  { %2749 = vsyncpa [#allocation4 + $0x1], 1 }
 0x257   :  { %2750 = vsyncpa [#allocation10], 1 }
 0x258   :  { %2752 = vsyncpa [#allocation10 + $0x1], 1 }

</bundles_post_ra>
